<compile_context>
chip_gen: v6e
topology: v6e:2x2x1
jax: 0.10.0
libtpu: 0.0.40
codegen_flags: <defaults>
</compile_context>

<pallas_src>
import functools

import jax
import jax.numpy as jnp
from jax.experimental import pallas as pl
from jax.experimental.pallas import tpu as pltpu

BN_EPS = 1e-5
_FUSED_VMEM_BUDGET = 8 * 1024 * 1024  # bytes resident for the single-kernel path


# -----------------------------------------------------------------------------
# Fused single-kernel path (small N*HW: x, residual, y and the output all fit
# comfortably in VMEM, so the whole op is one launch).
# -----------------------------------------------------------------------------
def _fused_conv_bn_add_kernel(x_ref, w_ref, res_ref, gamma_ref, beta_ref,
                              o_ref, y_ref):
    # x_ref:    (N, Cin, HW)   channels on sublanes, spatial on lanes
    # w_ref:    (Cout, Cin)    1x1-conv weight
    # res_ref:  (N, Cout, HW)  residual
    # gamma/beta: (Cout, 1)
    # o_ref:    (N, Cout, HW)  float32 output
    # y_ref:    (N, Cout, HW)  float32 VMEM scratch (conv output)
    n_img, _, hw = x_ref.shape
    inv_m = 1.0 / float(n_img * hw)
    w = w_ref[...]

    # 1x1 conv as a matmul per image + per-channel sums (static loop, N tiny).
    sum_c = jnp.zeros((w.shape[0], 1), jnp.float32)
    for n in range(n_img):
        y_n = jnp.dot(w, x_ref[n], preferred_element_type=jnp.float32)
        y_ref[n] = y_n
        sum_c = sum_c + jnp.sum(y_n, axis=-1, keepdims=True)
    mean = sum_c * inv_m

    # Numerically stable biased variance: mean((y - mean)^2), y is VMEM resident.
    var_c = jnp.zeros_like(sum_c)
    for n in range(n_img):
        d = y_ref[n] - mean
        var_c = var_c + jnp.sum(d * d, axis=-1, keepdims=True)
    var = var_c * inv_m

    scale = gamma_ref[...] * jax.lax.rsqrt(var + BN_EPS)   # (Cout, 1)
    shift = beta_ref[...] - mean * scale

    for n in range(n_img):
        o_ref[n] = (y_ref[n] * scale + shift
                    + res_ref[n].astype(jnp.float32)).astype(o_ref.dtype)


# -----------------------------------------------------------------------------
# Two-pass fallback for large N*HW.
# -----------------------------------------------------------------------------
def _conv_stats_kernel(x_ref, w_ref, y_ref, stats_ref):
    # x_ref: (1, Cin, T); w_ref: (Cout, Cin); y_ref: (1, Cout, T)
    # stats_ref: (1, 1, Cout, 2) packed [channel sum | channel sum of squares].
    y = jnp.dot(w_ref[...], x_ref[0], preferred_element_type=jnp.float32)
    y_ref[0] = y.astype(y_ref.dtype)
    s = jnp.sum(y, axis=-1, keepdims=True)
    ss = jnp.sum(y * y, axis=-1, keepdims=True)
    stats_ref[0, 0] = jnp.concatenate([s, ss], axis=-1)


def _bn_add_kernel(stats_ref, gamma_ref, beta_ref, y_ref, res_ref, o_ref, *,
                   inv_m):
    # stats_ref: (N, S, Cout, 2) full (tiny, constant block -> stays resident).
    # gamma/beta: (Cout, 1); y_ref/res_ref/o_ref: (1, Cout, T).
    # The scale/shift combine is recomputed per grid step (64 channels: noise);
    # this removes the separate XLA combine dispatch + intermediate HBM arrays.
    tot = jnp.sum(stats_ref[...], axis=(0, 1))             # (Cout, 2)
    mean = tot[:, 0:1] * inv_m
    # E[y^2] - E[y]^2 can cancel for large-mean channels; clamp guards rsqrt.
    # (The fused path uses the stable (y - mean)^2 form instead.)
    var = jnp.maximum(tot[:, 1:2] * inv_m - mean * mean, 0.0)
    scale = gamma_ref[...] * jax.lax.rsqrt(var + BN_EPS)
    shift = beta_ref[...] - mean * scale
    o_ref[0] = (y_ref[0].astype(jnp.float32) * scale + shift
                + res_ref[0].astype(jnp.float32)).astype(o_ref.dtype)


def _pick_spatial_tile(hw, max_tile):
    """Spatial tile T (lane axis) and padded extent HWp = S*T.

    - hw <= max_tile: one full-width tile, no padding.
    - hw % 128 == 0 with a reasonably large 128-multiple divisor tile: use it.
    - otherwise: pad hw up to S*T with T a large multiple of 128; the padded
      columns are zero-filled so they add nothing to the batch statistics.
    """
    max_tile = max(128, (max_tile // 128) * 128)
    if hw <= max_tile:
        return hw, hw
    if hw % 128 == 0:
        units = hw // 128
        for d in range(max_tile // 128, 0, -1):
            if units % d == 0 and d * 128 >= 512:
                return d * 128, hw
    s = -(-hw // max_tile)               # number of tiles (ceil)
    t = -(-hw // (s * 128)) * 128        # tile, rounded up to a 128 multiple
    return t, s * t


@functools.partial(
    jax.jit,
    static_argnames=("io_dtype", "max_tile", "force_two_pass",
                     "vmem_limit_bytes"))
def conv_bn_add(x, residual, conv_w, bn_gamma, bn_beta, *, io_dtype=None,
                max_tile=2048, force_two_pass=False, vmem_limit_bytes=None):
    """out = BatchNorm2d(Conv2d_1x1(x)) + residual (training-mode batch stats).

    x: [N, Cin, H, W], residual: [N, Cout, H, W], conv_w: [Cout, Cin, 1, 1].
    io_dtype: HBM dtype for x / the intermediate conv output (jnp.bfloat16
      halves the bandwidth-bound traffic); accumulation, stats and the final
      output stay float32.
    max_tile: spatial tile cap for the two-pass fallback.  2048 fits every
      generation's default scoped-VMEM limit; on v7x large-HW inputs ~4096 is
      ~10% faster — set vmem_limit_bytes accordingly (mandatory on v5e).
    """
    n, cin, h, w_sp = x.shape
    cout = conv_w.shape[0]
    hw = h * w_sp
    out_dtype = jnp.float32
    io_dtype = x.dtype if io_dtype is None else jnp.dtype(io_dtype)
    isz = jnp.dtype(io_dtype).itemsize

    # NCHW-native views: contiguous reshapes only, no transposes.
    xm = x.reshape(n, cin, hw).astype(io_dtype)
    rm = residual.reshape(n, cout, hw)
    wm = conv_w.reshape(cout, cin).astype(io_dtype)
    g = bn_gamma.reshape(cout, 1).astype(jnp.float32)
    b = bn_beta.reshape(cout, 1).astype(jnp.float32)

    # TODO(synk): PyTorch training-mode BN also updates running_mean/running_var
    # (unbiased variance, momentum=0.1) as a module side effect; not produced here.

    resident = n * hw * (cin * isz + cout * (4 + 4 + 4)) + cout * cin * isz
    if not force_two_pass and resident <= _FUSED_VMEM_BUDGET:
        # -------- fused single-kernel path (the shipped 1x384x28x28 shape) ----
        out = pl.pallas_call(
            _fused_conv_bn_add_kernel,
            out_shape=jax.ShapeDtypeStruct((n, cout, hw), out_dtype),
            scratch_shapes=[pltpu.VMEM((n, cout, hw), jnp.float32)],
            compiler_params=pltpu.CompilerParams(
                vmem_limit_bytes=vmem_limit_bytes),
            cost_estimate=pl.CostEstimate(
                flops=int(2 * n * hw * cin * cout + 8 * n * hw * cout),
                transcendentals=int(cout),
                bytes_accessed=int(n * cin * hw * isz + 8 * n * cout * hw
                                   + cout * cin * isz)),
        )(xm, wm, rm, g, b)
        return out.reshape(n, cout, h, w_sp)

    # --------------------- two-pass fallback (large N*HW) ---------------------
    t, hwp = _pick_spatial_tile(hw, max_tile)
    if hwp != hw:
        # Zero padding: padded columns give y == 0 exactly, so they contribute
        # nothing to the channel sums; padded output columns are sliced off.
        # TODO(synk): in-kernel tail masking would avoid this pad copy of x.
        pad = ((0, 0), (0, 0), (0, hwp - hw))
        xm = jnp.pad(xm, pad)
        rm = jnp.pad(rm, pad)
    s_tiles = hwp // t
    grid = (n, s_tiles)

    # Pass 1: 1x1 conv (matmul) + packed per-tile partial channel stats.
    y, stats = pl.pallas_call(
        _conv_stats_kernel,
        out_shape=(
            jax.ShapeDtypeStruct((n, cout, hwp), io_dtype),
            jax.ShapeDtypeStruct((n, s_tiles, cout, 2), jnp.float32),
        ),
        grid=grid,
        in_specs=[
            pl.BlockSpec((1, cin, t), lambda i, j: (i, 0, j)),
            pl.BlockSpec((cout, cin), lambda i, j: (0, 0)),
        ],
        out_specs=(
            pl.BlockSpec((1, cout, t), lambda i, j: (i, 0, j)),
            pl.BlockSpec((1, 1, cout, 2), lambda i, j: (i, j, 0, 0)),
        ),
        compiler_params=pltpu.CompilerParams(
            dimension_semantics=("parallel", "parallel"),
            vmem_limit_bytes=vmem_limit_bytes),
        cost_estimate=pl.CostEstimate(
            flops=int(2 * n * hwp * cin * cout + 3 * n * hwp * cout),
            transcendentals=0,
            bytes_accessed=int(n * cin * hwp * isz + cout * cin * isz
                               + n * cout * hwp * isz + n * s_tiles * cout * 8)),
    )(xm, wm)

    # Pass 2: in-kernel stats combine, then scale/shift FMA + residual add.
    kernel2 = functools.partial(_bn_add_kernel, inv_m=1.0 / float(n * hw))
    aliases = {3: 0} if io_dtype == out_dtype else {}
    out = pl.pallas_call(
        kernel2,
        out_shape=jax.ShapeDtypeStruct((n, cout, hwp), out_dtype),
        grid=grid,
        in_specs=[
            pl.BlockSpec((n, s_tiles, cout, 2), lambda i, j: (0, 0, 0, 0)),
            pl.BlockSpec((cout, 1), lambda i, j: (0, 0)),
            pl.BlockSpec((cout, 1), lambda i, j: (0, 0)),
            pl.BlockSpec((1, cout, t), lambda i, j: (i, 0, j)),
            pl.BlockSpec((1, cout, t), lambda i, j: (i, 0, j)),
        ],
        out_specs=pl.BlockSpec((1, cout, t), lambda i, j: (i, 0, j)),
        input_output_aliases=aliases,  # reuse y's HBM buffer when dtypes match
        compiler_params=pltpu.CompilerParams(
            dimension_semantics=("parallel", "parallel"),
            vmem_limit_bytes=vmem_limit_bytes),
        cost_estimate=pl.CostEstimate(
            flops=int(4 * n * hwp * cout),
            transcendentals=int(cout),
            bytes_accessed=int(n * cout * hwp * (isz + 4 + 4)
                               + n * s_tiles * cout * 8 + cout * 8)),
    )(stats, g, b, y, rm)

    if hwp != hw:
        out = out[:, :, :hw]
    return out.reshape(n, cout, h, w_sp)


def _reference(x186, x174, conv_w, bn_gamma, bn_beta):
    # Pure-JAX reference: 1x1 conv + training-mode BN (batch stats) + add.
    cout = conv_w.shape[0]
    y = jax.lax.conv_general_dilated(
        x186, conv_w, window_strides=(1, 1), padding="VALID",
        dimension_numbers=("NCHW", "OIHW", "NCHW"))
    mean = jnp.mean(y, axis=(0, 2, 3), keepdims=True)
    var = jnp.mean((y - mean) ** 2, axis=(0, 2, 3), keepdims=True)
    yn = (y - mean) / jnp.sqrt(var + BN_EPS)
    out = yn * bn_gamma.reshape(1, cout, 1, 1) + bn_beta.reshape(1, cout, 1, 1)
    return out + x174


if __name__ == "__main__":
    key = jax.random.PRNGKey(0)
    k1, k2, k3, k4, k5, k6, k7 = jax.random.split(key, 7)

    # Shapes straight from the module spec: 1x384x28x28 (+ 1x64x28x28 residual).
    n, h, w_sp = 1, 28, 28
    cin, cout = 384, 64

    x186 = jax.random.normal(k1, (n, cin, h, w_sp), dtype=jnp.float32)
    x174 = jax.random.normal(k2, (n, cout, h, w_sp), dtype=jnp.float32)

    # Deterministic synthetic parameters (not from a checkpoint).
    conv_w = jax.random.normal(k3, (cout, cin, 1, 1), dtype=jnp.float32) * 0.05
    bn_gamma = 1.0 + 0.1 * jax.random.normal(k4, (cout,), dtype=jnp.float32)
    bn_beta = 0.1 * jax.random.normal(k5, (cout,), dtype=jnp.float32)

    ref = _reference(x186, x174, conv_w, bn_gamma, bn_beta)

    # 1) Fused single-kernel path (the shipped shape), float32.
    out = jax.block_until_ready(
        conv_bn_add(x186, x174, conv_w, bn_gamma, bn_beta))
    assert out.shape == (n, cout, h, w_sp)
    assert jnp.allclose(out, ref, atol=1e-3, rtol=1e-3), (
        float(jnp.max(jnp.abs(out - ref))))

    # 2) Two-pass fallback, forced, on a non-128-divisible spatial size so the
    #    tile/padding path is exercised (HW=1600 -> T=512, padded to 2048).
    n2, h2, w2 = 2, 40, 40
    x2 = jax.random.normal(k6, (n2, cin, h2, w2), dtype=jnp.float32)
    r2 = jax.random.normal(k7, (n2, cout, h2, w2), dtype=jnp.float32)
    out2 = jax.block_until_ready(
        conv_bn_add(x2, r2, conv_w, bn_gamma, bn_beta,
                    force_two_pass=True, max_tile=512))
    ref2 = _reference(x2, r2, conv_w, bn_gamma, bn_beta)
    assert out2.shape == (n2, cout, h2, w2)
    assert jnp.allclose(out2, ref2, atol=1e-3, rtol=1e-3), (
        float(jnp.max(jnp.abs(out2 - ref2))))

    # 3) bf16 HBM-traffic variant of the fused path (f32 accumulation / stats).
    out_bf16 = jax.block_until_ready(
        conv_bn_add(x186, x174, conv_w, bn_gamma, bn_beta,
                    io_dtype=jnp.bfloat16))
    assert jnp.allclose(out_bf16, ref, atol=1e-1, rtol=1e-1), (
        float(jnp.max(jnp.abs(out_bf16 - ref))))

    print("KERNEL_OK")
</pallas_src>

<mosaic_0001>
module attributes {stable_mosaic.version = 11 : i64} {
  func.func @_fused_conv_bn_add_kernel(%arg0: memref<1x384x784xf32, #tpu.memory_space<vmem>>, %arg1: memref<64x384xf32, #tpu.memory_space<vmem>>, %arg2: memref<1x64x784xf32, #tpu.memory_space<vmem>>, %arg3: memref<64x1xf32, #tpu.memory_space<vmem>>, %arg4: memref<64x1xf32, #tpu.memory_space<vmem>>, %arg5: memref<1x64x784xf32, #tpu.memory_space<vmem>>, %arg6: memref<1x64x784xf32, #tpu.memory_space<vmem>>) attributes {dimension_semantics = [], scalar_prefetch = 0 : i64, scratch_operands = 1 : i64, tpu.core_type = #tpu.core_type<tc>} {
    %c0 = arith.constant 0 : index
    %c0_0 = arith.constant 0 : index
    %0 = vector.load %arg1[%c0, %c0_0] : memref<64x384xf32, #tpu.memory_space<vmem>>, vector<64x384xf32>
    %cst = arith.constant 0.000000e+00 : f32
    %1 = vector.broadcast %cst : f32 to vector<64x1xf32>
    %c0_1 = arith.constant 0 : index
    %c0_2 = arith.constant 0 : index
    %c0_3 = arith.constant 0 : index
    %2 = vector.load %arg0[%c0_1, %c0_2, %c0_3] : memref<1x384x784xf32, #tpu.memory_space<vmem>>, vector<1x384x784xf32>
    %3 = vector.shape_cast %2 : vector<1x384x784xf32> to vector<384x784xf32>
    %cst_4 = arith.constant dense<0.000000e+00> : vector<64x784xf32>
    %4 = tpu.matmul %0, %3, %cst_4 {dimension_numbers = #tpu.dot_dimension_numbers<[1], [0], [0], [1], [0, 0, 1, 1], [], []>} : vector<64x384xf32>, vector<384x784xf32>, vector<64x784xf32> -> vector<64x784xf32>
    %c0_5 = arith.constant 0 : index
    %c0_6 = arith.constant 0 : index
    %c0_7 = arith.constant 0 : index
    %5 = vector.load %arg6[%c0_5, %c0_6, %c0_7] : memref<1x64x784xf32, #tpu.memory_space<vmem>>, vector<1x64x784xf32>
    %6 = vector.shape_cast %5 : vector<1x64x784xf32> to vector<64x784xf32>
    %7 = vector.shape_cast %4 : vector<64x784xf32> to vector<1x64x784xf32>
    tpu.vector_store %arg6[%c0_5, %c0_6, %c0_7], %7 {strides = array<i32>} : memref<1x64x784xf32, #tpu.memory_space<vmem>>, vector<1x64x784xf32>,
    %cst_8 = arith.constant dense<0.000000e+00> : vector<64xf32>
    %8 = vector.multi_reduction <add>, %4, %cst_8 [1] : vector<64x784xf32> to vector<64xf32>
    %9 = vector.shape_cast %8 : vector<64xf32> to vector<64x1xf32>
    %10 = arith.addf %1, %9 : vector<64x1xf32>
    %cst_9 = arith.constant 0.00127551018 : f32
    %11 = vector.broadcast %cst_9 : f32 to vector<64x1xf32>
    %12 = arith.mulf %10, %11 : vector<64x1xf32>
    %cst_10 = arith.constant 0.000000e+00 : f32
    %13 = vector.broadcast %cst_10 : f32 to vector<64x1xf32>
    %c0_11 = arith.constant 0 : index
    %c0_12 = arith.constant 0 : index
    %c0_13 = arith.constant 0 : index
    %14 = vector.load %arg6[%c0_11, %c0_12, %c0_13] : memref<1x64x784xf32, #tpu.memory_space<vmem>>, vector<1x64x784xf32>
    %15 = vector.shape_cast %14 : vector<1x64x784xf32> to vector<64x784xf32>
    %16 = vector.broadcast %12 : vector<64x1xf32> to vector<64x784xf32>
    %17 = arith.subf %15, %16 : vector<64x784xf32>
    %18 = arith.mulf %17, %17 : vector<64x784xf32>
    %cst_14 = arith.constant dense<0.000000e+00> : vector<64xf32>
    %19 = vector.multi_reduction <add>, %18, %cst_14 [1] : vector<64x784xf32> to vector<64xf32>
    %20 = vector.shape_cast %19 : vector<64xf32> to vector<64x1xf32>
    %21 = arith.addf %13, %20 : vector<64x1xf32>
    %cst_15 = arith.constant 0.00127551018 : f32
    %22 = vector.broadcast %cst_15 : f32 to vector<64x1xf32>
    %23 = arith.mulf %21, %22 : vector<64x1xf32>
    %c0_16 = arith.constant 0 : index
    %c0_17 = arith.constant 0 : index
    %24 = vector.load %arg3[%c0_16, %c0_17] : memref<64x1xf32, #tpu.memory_space<vmem>>, vector<64x1xf32>
    %cst_18 = arith.constant 9.99999974E-6 : f32
    %25 = vector.broadcast %cst_18 : f32 to vector<64x1xf32>
    %26 = arith.addf %23, %25 : vector<64x1xf32>
    %27 = math.rsqrt %26 : vector<64x1xf32>
    %28 = arith.mulf %24, %27 : vector<64x1xf32>
    %c0_19 = arith.constant 0 : index
    %c0_20 = arith.constant 0 : index
    %29 = vector.load %arg4[%c0_19, %c0_20] : memref<64x1xf32, #tpu.memory_space<vmem>>, vector<64x1xf32>
    %30 = arith.mulf %12, %28 : vector<64x1xf32>
    %31 = arith.subf %29, %30 : vector<64x1xf32>
    %c0_21 = arith.constant 0 : index
    %c0_22 = arith.constant 0 : index
    %c0_23 = arith.constant 0 : index
    %32 = vector.load %arg6[%c0_21, %c0_22, %c0_23] : memref<1x64x784xf32, #tpu.memory_space<vmem>>, vector<1x64x784xf32>
    %33 = vector.shape_cast %32 : vector<1x64x784xf32> to vector<64x784xf32>
    %34 = vector.broadcast %28 : vector<64x1xf32> to vector<64x784xf32>
    %35 = arith.mulf %33, %34 : vector<64x784xf32>
    %36 = vector.broadcast %31 : vector<64x1xf32> to vector<64x784xf32>
    %37 = arith.addf %35, %36 : vector<64x784xf32>
    %c0_24 = arith.constant 0 : index
    %c0_25 = arith.constant 0 : index
    %c0_26 = arith.constant 0 : index
    %38 = vector.load %arg2[%c0_24, %c0_25, %c0_26] : memref<1x64x784xf32, #tpu.memory_space<vmem>>, vector<1x64x784xf32>
    %39 = vector.shape_cast %38 : vector<1x64x784xf32> to vector<64x784xf32>
    %40 = arith.addf %37, %39 : vector<64x784xf32>
    %c0_27 = arith.constant 0 : index
    %c0_28 = arith.constant 0 : index
    %c0_29 = arith.constant 0 : index
    %41 = vector.load %arg5[%c0_27, %c0_28, %c0_29] : memref<1x64x784xf32, #tpu.memory_space<vmem>>, vector<1x64x784xf32>
    %42 = vector.shape_cast %41 : vector<1x64x784xf32> to vector<64x784xf32>
    %43 = vector.shape_cast %40 : vector<64x784xf32> to vector<1x64x784xf32>
    tpu.vector_store %arg5[%c0_27, %c0_28, %c0_29], %43 {strides = array<i32>} : memref<1x64x784xf32, #tpu.memory_space<vmem>>, vector<1x64x784xf32>,
    return
  }
}

</mosaic_0001>

<bundles_post_ra>
// kernel: conv_bn_add.1
= control target key start
LH: loop header
LB: loop body
LE: loop exit
PB: predicated region body
PF: predicated region fallthrough
CT: control target
= control target key end

     0   :  { %v2312_v3 = vmov 0.0   ;;  %vm1274_vm0 = vcmask 130048   ;;  %s4494_s0 = inlined_call_operand.vmem [shape: f32[1,384,784], index: 0, kind: input, shape index: {}]   ;;  %s4495_s1 = inlined_call_operand.vmem [shape: f32[64,384], index: 1, kind: input, shape index: {}]   ;;  %s4496_s3 = inlined_call_operand.vmem [shape: f32[64,1], index: 3, kind: input, shape index: {}]   ;;  %s4497_s4 = inlined_call_operand.vmem [shape: f32[64,1], index: 4, kind: input, shape index: {}]   ;;  %s4498_s2 = inlined_call_operand.vmem [shape: f32[1,64,784], index: 2, kind: input, shape index: {}]   ;;  %s4499_s5 = inlined_call_operand.vmem [shape: f32[1,64,784], index: 5, kind: output, shape index: {}]  }
   0x1   :  { %v150_v0 = vld [vmem:[%s4494_s0 + $0x350] sm:$0xff]  ;;  %v149_v2 = vld [vmem:[%s4494_s0 + $0x348] sm:$0xff]  ;;  %557 = vmatprep.mubr.f32.mxu1 %v2312_v3  ;;  %v143_v5 = vld [vmem:[%s4494_s0 + $0x318] sm:$0xff] }
   0x2   :  { %v374_v1 = vld [vmem:[%s4494_s0 + $0xa50] sm:$0xff]  ;;  %380 = vmatprep.subr.mxu0 %v150_v0  ;;  %v373_v4 = vld [vmem:[%s4494_s0 + $0xa48] sm:$0xff]  ;;  %v367_v6 = vld [vmem:[%s4494_s0 + $0xa18] sm:$0xff] }
   0x3   :  { %493 = vmatprep.subr.mxu1 %v374_v1  ;;  %381 = vmatpush1.msra.mxu0 %v149_v2  ;;  %v142_v7 = vld [vmem:[%s4494_s0 + $0x310] sm:$0xff]  ;;  %v136_v9 = vld [vmem:[%s4494_s0 + $0x2e0] sm:$0xff]  ;;  %v135_v11 = vld [vmem:[%s4494_s0 + $0x2d8] sm:$0xff] }
   0x4   :  { %494 = vmatpush1.msra.mxu1 %v373_v4  ;;  %v366_v8 = vld [vmem:[%s4494_s0 + $0xa10] sm:$0xff]  ;;  %382 = vmatprep.subr.mxu0 %v143_v5  ;;  %v360_v10 = vld [vmem:[%s4494_s0 + $0x9e0] sm:$0xff]  ;;  %v359_v12 = vld [vmem:[%s4494_s0 + $0x9d8] sm:$0xff] }
   0x5   :  { %495 = vmatprep.subr.mxu1 %v367_v6  ;;  %383 = vmatpush1.msra.mxu0 %v142_v7  ;;  %v129_v13 = vld [vmem:[%s4494_s0 + $0x2a8] sm:$0xff]  ;;  %v128_v15 = vld [vmem:[%s4494_s0 + $0x2a0] sm:$0xff]  ;;  %v122_v17 = vld [vmem:[%s4494_s0 + $0x270] sm:$0xff] }
   0x6   :  { %496 = vmatpush1.msra.mxu1 %v366_v8  ;;  %v353_v14 = vld [vmem:[%s4494_s0 + $0x9a8] sm:$0xff]  ;;  %384 = vmatprep.subr.mxu0 %v136_v9  ;;  %v352_v16 = vld [vmem:[%s4494_s0 + $0x9a0] sm:$0xff]  ;;  %v346_v18 = vld [vmem:[%s4494_s0 + $0x970] sm:$0xff] }
   0x7   :  { %497 = vmatprep.subr.mxu1 %v360_v10  ;;  %385 = vmatpush1.msra.mxu0 %v135_v11  ;;  %v121_v19 = vld [vmem:[%s4494_s0 + $0x268] sm:$0xff]  ;;  %v115_v21 = vld [vmem:[%s4494_s0 + $0x238] sm:$0xff]  ;;  %v114_v23 = vld [vmem:[%s4494_s0 + $0x230] sm:$0xff] }
   0x8   :  { %498 = vmatpush1.msra.mxu1 %v359_v12  ;;  %386 = vmatprep.subr.mxu0 %v129_v13  ;;  %v345_v20 = vld [vmem:[%s4494_s0 + $0x968] sm:$0xff]  ;;  %v339_v22 = vld [vmem:[%s4494_s0 + $0x938] sm:$0xff]  ;;  %v338_v24 = vld [vmem:[%s4494_s0 + $0x930] sm:$0xff] }
   0x9   :  { %499 = vmatprep.subr.mxu1 %v353_v14  ;;  %387 = vmatpush1.msra.mxu0 %v128_v15  ;;  %v108_v25 = vld [vmem:[%s4494_s0 + $0x200] sm:$0xff]  ;;  %v107_v27 = vld [vmem:[%s4494_s0 + $0x1f8] sm:$0xff]  ;;  %v101_v29 = vld [vmem:[%s4494_s0 + $0x1c8] sm:$0xff] }
   0xa   :  { %500 = vmatpush1.msra.mxu1 %v352_v16  ;;  %388 = vmatprep.subr.mxu0 %v122_v17  ;;  %v332_v26 = vld [vmem:[%s4494_s0 + $0x900] sm:$0xff]  ;;  %v331_v28 = vld [vmem:[%s4494_s0 + $0x8f8] sm:$0xff]  ;;  %v325_v30 = vld [vmem:[%s4494_s0 + $0x8c8] sm:$0xff] }
   0xb   :  { %501 = vmatprep.subr.mxu1 %v346_v18  ;;  %389 = vmatpush1.msra.mxu0 %v121_v19  ;;  %v100_v31 = vld [vmem:[%s4494_s0 + $0x1c0] sm:$0xff]  ;;  %v94_v33 = vld [vmem:[%s4494_s0 + $0x190] sm:$0xff]  ;;  %v93_v35 = vld [vmem:[%s4494_s0 + $0x188] sm:$0xff] }
   0xc   :  { %502 = vmatpush1.msra.mxu1 %v345_v20  ;;  %390 = vmatprep.subr.mxu0 %v115_v21  ;;  %v324_v32 = vld [vmem:[%s4494_s0 + $0x8c0] sm:$0xff]  ;;  %v318_v34 = vld [vmem:[%s4494_s0 + $0x890] sm:$0xff]  ;;  %v317_v36 = vld [vmem:[%s4494_s0 + $0x888] sm:$0xff] }
   0xd   :  { %503 = vmatprep.subr.mxu1 %v339_v22  ;;  %391 = vmatpush1.msra.mxu0 %v114_v23  ;;  %v87_v37 = vld [vmem:[%s4494_s0 + $0x158] sm:$0xff]  ;;  %v86_v39 = vld [vmem:[%s4494_s0 + $0x150] sm:$0xff]  ;;  %v80_v41 = vld [vmem:[%s4494_s0 + $0x120] sm:$0xff] }
   0xe   :  { %504 = vmatpush1.msra.mxu1 %v338_v24  ;;  %392 = vmatprep.subr.mxu0 %v108_v25  ;;  %v311_v38 = vld [vmem:[%s4494_s0 + $0x858] sm:$0xff]  ;;  %v310_v40 = vld [vmem:[%s4494_s0 + $0x850] sm:$0xff]  ;;  %v304_v42 = vld [vmem:[%s4494_s0 + $0x820] sm:$0xff] }
   0xf   :  { %505 = vmatprep.subr.mxu1 %v332_v26  ;;  %393 = vmatpush1.msra.mxu0 %v107_v27  ;;  %v79_v43 = vld [vmem:[%s4494_s0 + $0x118] sm:$0xff]  ;;  %v73_v45 = vld [vmem:[%s4494_s0 + $0xe8] sm:$0xff]  ;;  %v72_v47 = vld [vmem:[%s4494_s0 + $0xe0] sm:$0xff] }
  0x10   :  { %506 = vmatpush1.msra.mxu1 %v331_v28  ;;  %394 = vmatprep.subr.mxu0 %v101_v29  ;;  %v303_v44 = vld [vmem:[%s4494_s0 + $0x818] sm:$0xff]  ;;  %v297_v46 = vld [vmem:[%s4494_s0 + $0x7e8] sm:$0xff]  ;;  %v296_v48 = vld [vmem:[%s4494_s0 + $0x7e0] sm:$0xff] }
  0x11   :  { %507 = vmatprep.subr.mxu1 %v325_v30  ;;  %395 = vmatpush1.msra.mxu0 %v100_v31  ;;  %v66_v49 = vld [vmem:[%s4494_s0 + $0xb0] sm:$0xff]  ;;  %v65_v51 = vld [vmem:[%s4494_s0 + $0xa8] sm:$0xff]  ;;  %v59_v53 = vld [vmem:[%s4494_s0 + $0x78] sm:$0xff] }
  0x12   :  { %508 = vmatpush1.msra.mxu1 %v324_v32  ;;  %396 = vmatprep.subr.mxu0 %v94_v33  ;;  %v290_v50 = vld [vmem:[%s4494_s0 + $0x7b0] sm:$0xff]  ;;  %v289_v52 = vld [vmem:[%s4494_s0 + $0x7a8] sm:$0xff]  ;;  %v283_v54 = vld [vmem:[%s4494_s0 + $0x778] sm:$0xff] }
  0x13   :  { %509 = vmatprep.subr.mxu1 %v318_v34  ;;  %397 = vmatpush1.msra.mxu0 %v93_v35  ;;  %v58_v55 = vld [vmem:[%s4494_s0 + $0x70] sm:$0xff]  ;;  %v52_v57 = vld [vmem:[%s4494_s0 + $0x40] sm:$0xff]  ;;  %v51_v59 = vld [vmem:[%s4494_s0 + $0x38] sm:$0xff] }
  0x14   :  { %510 = vmatpush1.msra.mxu1 %v317_v36  ;;  %398 = vmatprep.subr.mxu0 %v87_v37  ;;  %v282_v56 = vld [vmem:[%s4494_s0 + $0x770] sm:$0xff]  ;;  %v276_v58 = vld [vmem:[%s4494_s0 + $0x740] sm:$0xff]  ;;  %v275_v60 = vld [vmem:[%s4494_s0 + $0x738] sm:$0xff] }
  0x15   :  { %511 = vmatprep.subr.mxu1 %v311_v38  ;;  %399 = vmatpush1.msra.mxu0 %v86_v39  ;;  %v45_v61 = vld [vmem:[%s4494_s0 + $0x8] sm:$0xff]  ;;  %v44_v63 = vld [vmem:[%s4494_s0] sm:$0xff]  ;;  %v262_v1 = vld [vmem:[%s4494_s0 + $0x6d0] sm:$0xff] }
  0x16   :  { %512 = vmatpush1.msra.mxu1 %v310_v40  ;;  %400 = vmatprep.subr.mxu0 %v80_v41  ;;  %v269_v62 = vld [vmem:[%s4494_s0 + $0x708] sm:$0xff]  ;;  %v268_v0 = vld [vmem:[%s4494_s0 + $0x700] sm:$0xff]  ;;  %v2549_v5 = vld [vmem:[%s4495_s1 + $0x10] sm:$0xff] }
  0x17   :  { %513 = vmatprep.subr.mxu1 %v304_v42  ;;  %401 = vmatpush1.msra.mxu0 %v79_v43  ;;  %v152_v2 = vld [vmem:[%s4494_s0 + $0x360] sm:$0xff]  ;;  %v261_v4 = vld [vmem:[%s4494_s0 + $0x6c8] sm:$0xff]  ;;  %v151_v6 = vld [vmem:[%s4494_s0 + $0x358] sm:$0xff] }
  0x18   :  { %514 = vmatpush1.msra.mxu1 %v303_v44  ;;  %402 = vmatprep.subr.mxu0 %v73_v45  ;;  %v255_v7 = vld [vmem:[%s4494_s0 + $0x698] sm:$0xff]  ;;  %v145_v8 = vld [vmem:[%s4494_s0 + $0x328] sm:$0xff]  ;;  %v254_v9 = vld [vmem:[%s4494_s0 + $0x690] sm:$0xff] }
  0x19   :  { %515 = vmatprep.subr.mxu1 %v297_v46  ;;  %403 = vmatpush1.msra.mxu0 %v72_v47  ;;  %v144_v10 = vld [vmem:[%s4494_s0 + $0x320] sm:$0xff]  ;;  %v138_v12 = vld [vmem:[%s4494_s0 + $0x2f0] sm:$0xff]  ;;  %v247_v13 = vld [vmem:[%s4494_s0 + $0x658] sm:$0xff] }
  0x1a   :  { %516 = vmatpush1.msra.mxu1 %v296_v48  ;;  %404 = vmatprep.subr.mxu0 %v66_v49  ;;  %v248_v11 = vld [vmem:[%s4494_s0 + $0x660] sm:$0xff]  ;;  %v137_v14 = vld [vmem:[%s4494_s0 + $0x2e8] sm:$0xff]  ;;  %v131_v16 = vld [vmem:[%s4494_s0 + $0x2b8] sm:$0xff] }
  0x1b   :  { %517 = vmatprep.subr.mxu1 %v290_v50  ;;  %405 = vmatpush1.msra.mxu0 %v65_v51  ;;  %v241_v15 = vld [vmem:[%s4494_s0 + $0x628] sm:$0xff]  ;;  %v240_v17 = vld [vmem:[%s4494_s0 + $0x620] sm:$0xff]  ;;  %v130_v18 = vld [vmem:[%s4494_s0 + $0x2b0] sm:$0xff] }
  0x1c   :  { %518 = vmatpush1.msra.mxu1 %v289_v52  ;;  %406 = vmatprep.subr.mxu0 %v59_v53  ;;  %v234_v19 = vld [vmem:[%s4494_s0 + $0x5f0] sm:$0xff]  ;;  %v124_v20 = vld [vmem:[%s4494_s0 + $0x280] sm:$0xff]  ;;  %v233_v21 = vld [vmem:[%s4494_s0 + $0x5e8] sm:$0xff] }
  0x1d   :  { %519 = vmatprep.subr.mxu1 %v283_v54  ;;  %407 = vmatpush1.msra.mxu0 %v58_v55  ;;  %v123_v22 = vld [vmem:[%s4494_s0 + $0x278] sm:$0xff]  ;;  %v117_v24 = vld [vmem:[%s4494_s0 + $0x248] sm:$0xff]  ;;  %v226_v25 = vld [vmem:[%s4494_s0 + $0x5b0] sm:$0xff] }
  0x1e   :  { %520 = vmatpush1.msra.mxu1 %v282_v56  ;;  %408 = vmatprep.subr.mxu0 %v52_v57  ;;  %v227_v23 = vld [vmem:[%s4494_s0 + $0x5b8] sm:$0xff]  ;;  %v116_v26 = vld [vmem:[%s4494_s0 + $0x240] sm:$0xff]  ;;  %v110_v28 = vld [vmem:[%s4494_s0 + $0x210] sm:$0xff] }
  0x1f   :  { %521 = vmatprep.subr.mxu1 %v276_v58  ;;  %409 = vmatpush1.msra.mxu0 %v51_v59  ;;  %v220_v27 = vld [vmem:[%s4494_s0 + $0x580] sm:$0xff]  ;;  %v219_v29 = vld [vmem:[%s4494_s0 + $0x578] sm:$0xff]  ;;  %v109_v30 = vld [vmem:[%s4494_s0 + $0x208] sm:$0xff] }
  0x20   :  { %522 = vmatpush1.msra.mxu1 %v275_v60  ;;  %410 = vmatprep.subr.mxu0 %v45_v61  ;;  %v213_v31 = vld [vmem:[%s4494_s0 + $0x548] sm:$0xff]  ;;  %v103_v32 = vld [vmem:[%s4494_s0 + $0x1d8] sm:$0xff]  ;;  %v212_v33 = vld [vmem:[%s4494_s0 + $0x540] sm:$0xff] }
  0x21   :  { %523 = vmatprep.subr.mxu1 %v269_v62  ;;  %411 = vmatpush1.msra.mxu0 %v44_v63  ;;  %v102_v34 = vld [vmem:[%s4494_s0 + $0x1d0] sm:$0xff]  ;;  %v96_v36 = vld [vmem:[%s4494_s0 + $0x1a0] sm:$0xff]  ;;  %v205_v37 = vld [vmem:[%s4494_s0 + $0x508] sm:$0xff] }
  0x22   :  { %524 = vmatpush1.msra.mxu1 %v268_v0  ;;  %412 = vmatprep.subr.mxu0 %v262_v1  ;;  %v206_v35 = vld [vmem:[%s4494_s0 + $0x510] sm:$0xff]  ;;  %v95_v38 = vld [vmem:[%s4494_s0 + $0x198] sm:$0xff]  ;;  %v89_v40 = vld [vmem:[%s4494_s0 + $0x168] sm:$0xff] }
  0x23   :  { %606 = vmatprep.subr.mxu1 %v152_v2  ;;  %413 = vmatpush2.msra.mxu0 %v261_v4  ;;  %v199_v39 = vld [vmem:[%s4494_s0 + $0x4d8] sm:$0xff]  ;;  %v198_v41 = vld [vmem:[%s4494_s0 + $0x4d0] sm:$0xff]  ;;  %v88_v42 = vld [vmem:[%s4494_s0 + $0x160] sm:$0xff] }
  0x24   :  { %558 = vmatmul.mubr.f32.vlgmr.msra.gmra.mxu1 %v2549_v5  ;;  %414 = vmatprep.subr.mxu0 %v255_v7  ;;  %v192_v43 = vld [vmem:[%s4494_s0 + $0x4a0] sm:$0xff]  ;;  %v82_v44 = vld [vmem:[%s4494_s0 + $0x130] sm:$0xff]  ;;  %v191_v45 = vld [vmem:[%s4494_s0 + $0x498] sm:$0xff] }
  0x25   :  { %607 = vmatpush1.msra.mxu1 %v151_v6  ;;  %415 = vmatpush2.msra.mxu0 %v254_v9  ;;  %v81_v46 = vld [vmem:[%s4494_s0 + $0x128] sm:$0xff]  ;;  %v75_v48 = vld [vmem:[%s4494_s0 + $0xf8] sm:$0xff]  ;;  %v184_v49 = vld [vmem:[%s4494_s0 + $0x460] sm:$0xff] }
  0x26   :  { %608 = vmatprep.subr.mxu1 %v145_v8  ;;  %416 = vmatprep.subr.mxu0 %v248_v11  ;;  %v185_v47 = vld [vmem:[%s4494_s0 + $0x468] sm:$0xff]  ;;  %v74_v50 = vld [vmem:[%s4494_s0 + $0xf0] sm:$0xff]  ;;  %v68_v52 = vld [vmem:[%s4494_s0 + $0xc0] sm:$0xff] }
  0x27   :  { %609 = vmatpush1.msra.mxu1 %v144_v10  ;;  %417 = vmatpush2.msra.mxu0 %v247_v13  ;;  %v178_v51 = vld [vmem:[%s4494_s0 + $0x430] sm:$0xff]  ;;  %v177_v53 = vld [vmem:[%s4494_s0 + $0x428] sm:$0xff]  ;;  %v67_v54 = vld [vmem:[%s4494_s0 + $0xb8] sm:$0xff] }
  0x28   :  { %610 = vmatprep.subr.mxu1 %v138_v12  ;;  %418 = vmatprep.subr.mxu0 %v241_v15  ;;  %v171_v55 = vld [vmem:[%s4494_s0 + $0x3f8] sm:$0xff]  ;;  %v61_v56 = vld [vmem:[%s4494_s0 + $0x88] sm:$0xff]  ;;  %v170_v57 = vld [vmem:[%s4494_s0 + $0x3f0] sm:$0xff] }
  0x29   :  { %611 = vmatpush1.msra.mxu1 %v137_v14  ;;  %419 = vmatpush2.msra.mxu0 %v240_v17  ;;  %v60_v58 = vld [vmem:[%s4494_s0 + $0x80] sm:$0xff]  ;;  %v54_v60 = vld [vmem:[%s4494_s0 + $0x50] sm:$0xff]  ;;  %v163_v61 = vld [vmem:[%s4494_s0 + $0x3b8] sm:$0xff] }
  0x2a   :  { %612 = vmatprep.subr.mxu1 %v131_v16  ;;  %420 = vmatprep.subr.mxu0 %v234_v19  ;;  %v164_v59 = vld [vmem:[%s4494_s0 + $0x3c0] sm:$0xff]  ;;  %v53_v62 = vld [vmem:[%s4494_s0 + $0x48] sm:$0xff]  ;;  %v47_v0 = vld [vmem:[%s4494_s0 + $0x18] sm:$0xff] }
  0x2b   :  { %613 = vmatpush1.msra.mxu1 %v130_v18  ;;  %421 = vmatpush2.msra.mxu0 %v233_v21  ;;  %v157_v63 = vld [vmem:[%s4494_s0 + $0x388] sm:$0xff]  ;;  %v156_v1 = vld [vmem:[%s4494_s0 + $0x380] sm:$0xff]  ;;  %v46_v4 = vld [vmem:[%s4494_s0 + $0x10] sm:$0xff] }
  0x2c   :  { %614 = vmatprep.subr.mxu1 %v124_v20  ;;  %422 = vmatprep.subr.mxu0 %v227_v23  ;;  %v2735_v2 = vld [vmem:[%s4495_s1 + $0x8] sm:$0xff]  ;;  %v2743_v6 = vld [vmem:[%s4495_s1] sm:$0xff]  ;;  %v263_v9 = vld [vmem:[%s4494_s0 + $0x6d8] sm:$0xff] }
  0x2d   :  { %615 = vmatpush1.msra.mxu1 %v123_v22  ;;  %423 = vmatpush2.msra.mxu0 %v226_v25  ;;  %v264_v7 = vld [vmem:[%s4494_s0 + $0x6e0] sm:$0xff]  ;;  %v375_v10 = vld [vmem:[%s4494_s0 + $0xa58] sm:$0xff]  ;;  %v257_v11 = vld [vmem:[%s4494_s0 + $0x6a8] sm:$0xff] }
  0x2e   :  { %616 = vmatprep.subr.mxu1 %v117_v24  ;;  %424 = vmatprep.subr.mxu0 %v220_v27  ;;  %v376_v8 = vld [vmem:[%s4494_s0 + $0xa60] sm:$0xff]  ;;  %v369_v12 = vld [vmem:[%s4494_s0 + $0xa28] sm:$0xff]  ;;  %v2785_v17 = vld [vmem:[%s4495_s1 + $0x18] sm:$0xff] }
  0x2f   :  { %617 = vmatpush1.msra.mxu1 %v116_v26  ;;  %425 = vmatpush2.msra.mxu0 %v219_v29  ;;  %v2768_v13 = vld [vmem:[%s4495_s1 + $0x20] sm:$0xff]  ;;  %v2779_v16 = vld [vmem:[%s4495_s1 + $0x28] sm:$0xff]  ;;  %v250_v18 = vld [vmem:[%s4494_s0 + $0x670] sm:$0xff] }
  0x30   :  { %618 = vmatprep.subr.mxu1 %v110_v28  ;;  %426 = vmatprep.subr.mxu0 %v213_v31  ;;  %v256_v14 = vld [vmem:[%s4494_s0 + $0x6a0] sm:$0xff]  ;;  %v362_v19 = vld [vmem:[%s4494_s0 + $0x9f0] sm:$0xff]  ;;  %v249_v20 = vld [vmem:[%s4494_s0 + $0x668] sm:$0xff] }
  0x31   :  { %619 = vmatpush1.msra.mxu1 %v109_v30  ;;  %427 = vmatpush2.msra.mxu0 %v212_v33  ;;  %v368_v15 = vld [vmem:[%s4494_s0 + $0xa20] sm:$0xff]  ;;  %v361_v21 = vld [vmem:[%s4494_s0 + $0x9e8] sm:$0xff]  ;;  %v243_v22 = vld [vmem:[%s4494_s0 + $0x638] sm:$0xff] }
  0x32   :  { %620 = vmatprep.subr.mxu1 %v103_v32  ;;  %428 = vmatprep.subr.mxu0 %v206_v35  ;;  %v355_v23 = vld [vmem:[%s4494_s0 + $0x9b8] sm:$0xff]  ;;  %v242_v25 = vld [vmem:[%s4494_s0 + $0x630] sm:$0xff]  ;;  %v2822_v27 = vld [vmem:[%s4495_s1 + $0x40] sm:$0xff] }
  0x33   :  { %621 = vmatpush1.msra.mxu1 %v102_v34  ;;  %429 = vmatpush2.msra.mxu0 %v205_v37  ;;  %v2811_v24 = vld [vmem:[%s4495_s1 + $0x38] sm:$0xff]  ;;  %v354_v26 = vld [vmem:[%s4494_s0 + $0x9b0] sm:$0xff]  ;;  %v236_v29 = vld [vmem:[%s4494_s0 + $0x600] sm:$0xff] }
  0x34   :  { %622 = vmatprep.subr.mxu1 %v96_v36  ;;  %430 = vmatprep.subr.mxu0 %v199_v39  ;;  %v2828_v28 = vld [vmem:[%s4495_s1 + $0x30] sm:$0xff]  ;;  %v348_v30 = vld [vmem:[%s4494_s0 + $0x980] sm:$0xff]  ;;  %v235_v31 = vld [vmem:[%s4494_s0 + $0x5f8] sm:$0xff] }
  0x35   :  { %623 = vmatpush1.msra.mxu1 %v95_v38  ;;  %431 = vmatpush2.msra.mxu0 %v198_v41  ;;  %v347_v32 = vld [vmem:[%s4494_s0 + $0x978] sm:$0xff]  ;;  %v229_v33 = vld [vmem:[%s4494_s0 + $0x5c8] sm:$0xff]  ;;  %v2854_v35 = vld [vmem:[%s4495_s1 + $0x50] sm:$0xff] }
  0x36   :  { %624 = vmatprep.subr.mxu1 %v89_v40  ;;  %432 = vmatprep.subr.mxu0 %v192_v43  ;;  %v341_v34 = vld [vmem:[%s4494_s0 + $0x948] sm:$0xff]  ;;  %v228_v36 = vld [vmem:[%s4494_s0 + $0x5c0] sm:$0xff]  ;;  %v2865_v38 = vld [vmem:[%s4495_s1 + $0x58] sm:$0xff] }
  0x37   :  { %625 = vmatpush1.msra.mxu1 %v88_v42  ;;  %433 = vmatpush2.msra.mxu0 %v191_v45  ;;  %v340_v37 = vld [vmem:[%s4494_s0 + $0x940] sm:$0xff]  ;;  %v2871_v39 = vld [vmem:[%s4495_s1 + $0x48] sm:$0xff]  ;;  %v222_v40 = vld [vmem:[%s4494_s0 + $0x590] sm:$0xff] }
  0x38   :  { %626 = vmatprep.subr.mxu1 %v82_v44  ;;  %434 = vmatprep.subr.mxu0 %v185_v47  ;;  %v334_v41 = vld [vmem:[%s4494_s0 + $0x910] sm:$0xff]  ;;  %v221_v42 = vld [vmem:[%s4494_s0 + $0x588] sm:$0xff]  ;;  %v215_v44 = vld [vmem:[%s4494_s0 + $0x558] sm:$0xff] }
  0x39   :  { %627 = vmatpush1.msra.mxu1 %v81_v46  ;;  %435 = vmatpush2.msra.mxu0 %v184_v49  ;;  %v333_v43 = vld [vmem:[%s4494_s0 + $0x908] sm:$0xff]  ;;  %v327_v45 = vld [vmem:[%s4494_s0 + $0x8d8] sm:$0xff]  ;;  %v214_v47 = vld [vmem:[%s4494_s0 + $0x550] sm:$0xff] }
  0x3a   :  { %628 = vmatprep.subr.mxu1 %v75_v48  ;;  %436 = vmatprep.subr.mxu0 %v178_v51  ;;  %v2897_v46 = vld [vmem:[%s4495_s1 + $0x68] sm:$0xff]  ;;  %v326_v48 = vld [vmem:[%s4494_s0 + $0x8d0] sm:$0xff]  ;;  %v208_v51 = vld [vmem:[%s4494_s0 + $0x520] sm:$0xff] }
  0x3b   :  { %629 = vmatpush1.msra.mxu1 %v74_v50  ;;  %437 = vmatpush2.msra.mxu0 %v177_v53  ;;  %v2908_v49 = vld [vmem:[%s4495_s1 + $0x70] sm:$0xff]  ;;  %v2914_v50 = vld [vmem:[%s4495_s1 + $0x60] sm:$0xff]  ;;  %v207_v53 = vld [vmem:[%s4494_s0 + $0x518] sm:$0xff] }
  0x3c   :  { %630 = vmatprep.subr.mxu1 %v68_v52  ;;  %438 = vmatprep.subr.mxu0 %v171_v55  ;;  %v320_v52 = vld [vmem:[%s4494_s0 + $0x8a0] sm:$0xff]  ;;  %v201_v55 = vld [vmem:[%s4494_s0 + $0x4e8] sm:$0xff] }
  0x3d   :  { %631 = vmatpush1.msra.mxu1 %v67_v54  ;;  %439 = vmatpush2.msra.mxu0 %v170_v57  ;;  %v319_v54 = vld [vmem:[%s4494_s0 + $0x898] sm:$0xff]  ;;  %v2940_v57 = vld [vmem:[%s4495_s1 + $0x80] sm:$0xff] }
  0x3e   :  { %632 = vmatprep.subr.mxu1 %v61_v56  ;;  %440 = vmatprep.subr.mxu0 %v164_v59  ;;  %v313_v56 = vld [vmem:[%s4494_s0 + $0x868] sm:$0xff]  ;;  %v312_v59 = vld [vmem:[%s4494_s0 + $0x860] sm:$0xff] }
  0x3f   :  { %633 = vmatpush1.msra.mxu1 %v60_v58  ;;  %441 = vmatpush2.msra.mxu0 %v163_v61  ;;  %v200_v58 = vld [vmem:[%s4494_s0 + $0x4e0] sm:$0xff]  ;;  %v2957_v61 = vld [vmem:[%s4495_s1 + $0x78] sm:$0xff] }
  0x40   :  { %634 = vmatprep.subr.mxu1 %v54_v60  ;;  %442 = vmatprep.subr.mxu0 %v157_v63  ;;  %v2951_v60 = vld [vmem:[%s4495_s1 + $0x88] sm:$0xff]  ;;  %v306_v63 = vld [vmem:[%s4494_s0 + $0x830] sm:$0xff] }
  0x41   :  { %635 = vmatpush1.msra.mxu1 %v53_v62  ;;  %443 = vmatpush2.msra.mxu0 %v156_v1  ;;  %v194_v62 = vld [vmem:[%s4494_s0 + $0x4b0] sm:$0xff]  ;;  %v305_v1 = vld [vmem:[%s4494_s0 + $0x828] sm:$0xff] }
  0x42   :  { %636 = vmatprep.subr.mxu1 %v47_v0  ;;  %444 = vmatprep.mubr.f32.mxu0 %v2735_v2  ;;  %v193_v0 = vld [vmem:[%s4494_s0 + $0x4a8] sm:$0xff] }
  0x43   :  { %637 = vmatpush1.msra.mxu1 %v46_v4  ;;  %445 = vmatmul.mubr.f32.vlgmr.msra.gmra.mxu0 %v2743_v6  ;;  %v187_v4 = vld [vmem:[%s4494_s0 + $0x478] sm:$0xff] }
  0x44   :  { %638 = vmatprep.subr.mxu1 %v264_v7  ;;  %719 = vmatprep.subr.mxu0 %v376_v8  ;;  %v299_v7 = vld [vmem:[%s4494_s0 + $0x7f8] sm:$0xff] }
  0x45   :  { %639 = vmatpush2.msra.mxu1 %v263_v9  ;;  %720 = vmatpush1.msra.mxu0 %v375_v10  ;;  %v2983_v8 = vld [vmem:[%s4495_s1 + $0x98] sm:$0xff]  ;;  %v186_v9 = vld [vmem:[%s4494_s0 + $0x470] sm:$0xff] }
  0x46   :  { %640 = vmatprep.subr.mxu1 %v257_v11  ;;  %721 = vmatprep.subr.mxu0 %v369_v12  ;;  %v298_v10 = vld [vmem:[%s4494_s0 + $0x7f0] sm:$0xff]  ;;  %v2994_v11 = vld [vmem:[%s4495_s1 + $0xa0] sm:$0xff] }
  0x47   :  { %450 = vmatprep.mubr.f32.mxu0 %v2768_v13  ;;  %563 = vmatprep.mubr.f32.mxu1 %v2312_v3  ;;  %v3000_v12 = vld [vmem:[%s4495_s1 + $0x90] sm:$0xff] }
  0x48   :  { %641 = vmatpush2.msra.mxu1 %v256_v14  ;;  %722 = vmatpush1.msra.mxu0 %v368_v15  ;;  %v180_v14 = vld [vmem:[%s4494_s0 + $0x440] sm:$0xff] }
  0x49   :  { %564 = vmatmul.mubr.f32.gmra.mxu1 %v2779_v16  ;;  %451 = vmatmul.mubr.f32.gmra.mxu0 %v2785_v17  ;;  %v292_v15 = vld [vmem:[%s4494_s0 + $0x7c0] sm:$0xff] }
  0x4a   :  { %642 = vmatprep.subr.mxu1 %v250_v18  ;;  %723 = vmatprep.subr.mxu0 %v362_v19  ;;  %v179_v18 = vld [vmem:[%s4494_s0 + $0x438] sm:$0xff] }
  0x4b   :  { %643 = vmatpush2.msra.mxu1 %v249_v20  ;;  %724 = vmatpush1.msra.mxu0 %v361_v21  ;;  %v291_v19 = vld [vmem:[%s4494_s0 + $0x7b8] sm:$0xff]  ;;  %v173_v20 = vld [vmem:[%s4494_s0 + $0x408] sm:$0xff] }
  0x4c   :  { %644 = vmatprep.subr.mxu1 %v243_v22  ;;  %725 = vmatprep.subr.mxu0 %v355_v23  ;;  %v285_v21 = vld [vmem:[%s4494_s0 + $0x788] sm:$0xff]  ;;  %v3026_v22 = vld [vmem:[%s4495_s1 + $0xb0] sm:$0xff]  ;;  %v172_v23 = vld [vmem:[%s4494_s0 + $0x400] sm:$0xff] }
  0x4d   :  { %456 = vmatprep.mubr.f32.mxu0 %v2811_v24  ;;  %569 = vmatprep.mubr.f32.mxu1 %v2312_v3 }
  0x4e   :  { %645 = vmatpush2.msra.mxu1 %v242_v25  ;;  %726 = vmatpush1.msra.mxu0 %v354_v26  ;;  %v284_v25 = vld [vmem:[%s4494_s0 + $0x780] sm:$0xff]  ;;  %v3037_v26 = vld [vmem:[%s4495_s1 + $0xb8] sm:$0xff] }
  0x4f   :  { %570 = vmatmul.mubr.f32.gmra.mxu1 %v2822_v27  ;;  %457 = vmatmul.mubr.f32.gmra.mxu0 %v2828_v28 }
  0x50   :  { %646 = vmatprep.subr.mxu1 %v236_v29  ;;  %727 = vmatprep.subr.mxu0 %v348_v30  ;;  %v3043_v29 = vld [vmem:[%s4495_s1 + $0xa8] sm:$0xff]  ;;  %v166_v30 = vld [vmem:[%s4494_s0 + $0x3d0] sm:$0xff] }
  0x51   :  { %647 = vmatpush2.msra.mxu1 %v235_v31  ;;  %728 = vmatpush1.msra.mxu0 %v347_v32  ;;  %v278_v31 = vld [vmem:[%s4494_s0 + $0x750] sm:$0xff]  ;;  %v165_v32 = vld [vmem:[%s4494_s0 + $0x3c8] sm:$0xff] }
  0x52   :  { %648 = vmatprep.subr.mxu1 %v229_v33  ;;  %729 = vmatprep.subr.mxu0 %v341_v34  ;;  %v277_v33 = vld [vmem:[%s4494_s0 + $0x748] sm:$0xff]  ;;  %v159_v34 = vld [vmem:[%s4494_s0 + $0x398] sm:$0xff] }
  0x53   :  { %462 = vmatprep.mubr.f32.mxu0 %v2854_v35  ;;  %575 = vmatprep.mubr.f32.mxu1 %v2312_v3 }
  0x54   :  { %649 = vmatpush2.msra.mxu1 %v228_v36  ;;  %730 = vmatpush1.msra.mxu0 %v340_v37  ;;  %v271_v36 = vld [vmem:[%s4494_s0 + $0x718] sm:$0xff]  ;;  %v158_v37 = vld [vmem:[%s4494_s0 + $0x390] sm:$0xff] }
  0x55   :  { %576 = vmatmul.mubr.f32.gmra.mxu1 %v2865_v38  ;;  %463 = vmatmul.mubr.f32.gmra.mxu0 %v2871_v39 }
  0x56   :  { %650 = vmatprep.subr.mxu1 %v222_v40  ;;  %731 = vmatprep.subr.mxu0 %v334_v41  ;;  %v270_v40 = vld [vmem:[%s4494_s0 + $0x710] sm:$0xff] }
  0x57   :  { %651 = vmatpush2.msra.mxu1 %v221_v42  ;;  %732 = vmatpush1.msra.mxu0 %v333_v43  ;;  %v154_v41 = vld [vmem:[%s4494_s0 + $0x370] sm:$0xff]  ;;  %v153_v43 = vld [vmem:[%s4494_s0 + $0x368] sm:$0xff] }
  0x58   :  { %652 = vmatprep.subr.mxu1 %v215_v44  ;;  %733 = vmatprep.subr.mxu0 %v327_v45  ;;  %v378_v42 = vld [vmem:[%s4494_s0 + $0xa70] sm:$0xff]  ;;  %v377_v44 = vld [vmem:[%s4494_s0 + $0xa68] sm:$0xff]  ;;  %v147_v45 = vld [vmem:[%s4494_s0 + $0x338] sm:$0xff] }
  0x59   :  { %468 = vmatprep.mubr.f32.mxu0 %v2897_v46  ;;  %581 = vmatprep.mubr.f32.mxu1 %v2312_v3 }
  0x5a   :  { %653 = vmatpush2.msra.mxu1 %v214_v47  ;;  %734 = vmatpush1.msra.mxu0 %v326_v48  ;;  %v371_v47 = vld [vmem:[%s4494_s0 + $0xa38] sm:$0xff]  ;;  %v146_v48 = vld [vmem:[%s4494_s0 + $0x330] sm:$0xff] }
  0x5b   :  { %582 = vmatmul.mubr.f32.gmra.mxu1 %v2908_v49  ;;  %469 = vmatmul.mubr.f32.gmra.mxu0 %v2914_v50 }
  0x5c   :  { %654 = vmatprep.subr.mxu1 %v208_v51  ;;  %735 = vmatprep.subr.mxu0 %v320_v52  ;;  %v370_v51 = vld [vmem:[%s4494_s0 + $0xa30] sm:$0xff]  ;;  %v140_v52 = vld [vmem:[%s4494_s0 + $0x300] sm:$0xff] }
  0x5d   :  { %655 = vmatpush2.msra.mxu1 %v207_v53  ;;  %736 = vmatpush1.msra.mxu0 %v319_v54  ;;  %v364_v53 = vld [vmem:[%s4494_s0 + $0xa00] sm:$0xff]  ;;  %v139_v54 = vld [vmem:[%s4494_s0 + $0x2f8] sm:$0xff] }
  0x5e   :  { %656 = vmatprep.subr.mxu1 %v201_v55  ;;  %737 = vmatprep.subr.mxu0 %v313_v56  ;;  %v363_v55 = vld [vmem:[%s4494_s0 + $0x9f8] sm:$0xff]  ;;  %v133_v56 = vld [vmem:[%s4494_s0 + $0x2c8] sm:$0xff] }
  0x5f   :  { %474 = vmatprep.mubr.f32.mxu0 %v2940_v57  ;;  %587 = vmatprep.mubr.f32.mxu1 %v2312_v3 }
  0x60   :  { %657 = vmatpush2.msra.mxu1 %v200_v58  ;;  %738 = vmatpush1.msra.mxu0 %v312_v59  ;;  %v357_v58 = vld [vmem:[%s4494_s0 + $0x9c8] sm:$0xff]  ;;  %v132_v59 = vld [vmem:[%s4494_s0 + $0x2c0] sm:$0xff] }
  0x61   :  { %588 = vmatmul.mubr.f32.gmra.mxu1 %v2951_v60  ;;  %475 = vmatmul.mubr.f32.gmra.mxu0 %v2957_v61 }
  0x62   :  { %658 = vmatprep.subr.mxu1 %v194_v62  ;;  %739 = vmatprep.subr.mxu0 %v306_v63  ;;  %v356_v62 = vld [vmem:[%s4494_s0 + $0x9c0] sm:$0xff]  ;;  %v126_v63 = vld [vmem:[%s4494_s0 + $0x290] sm:$0xff] }
  0x63   :  { %659 = vmatpush2.msra.mxu1 %v193_v0  ;;  %740 = vmatpush1.msra.mxu0 %v305_v1  ;;  %v350_v0 = vld [vmem:[%s4494_s0 + $0x990] sm:$0xff]  ;;  %v125_v1 = vld [vmem:[%s4494_s0 + $0x288] sm:$0xff] }
  0x64   :  { %660 = vmatprep.subr.mxu1 %v187_v4  ;;  %741 = vmatprep.subr.mxu0 %v299_v7  ;;  %v349_v4 = vld [vmem:[%s4494_s0 + $0x988] sm:$0xff]  ;;  %v119_v7 = vld [vmem:[%s4494_s0 + $0x258] sm:$0xff] }
  0x65   :  { %480 = vmatprep.mubr.f32.mxu0 %v2983_v8  ;;  %593 = vmatprep.mubr.f32.mxu1 %v2312_v3 }
  0x66   :  { %661 = vmatpush2.msra.mxu1 %v186_v9  ;;  %742 = vmatpush1.msra.mxu0 %v298_v10  ;;  %v343_v9 = vld [vmem:[%s4494_s0 + $0x958] sm:$0xff]  ;;  %v118_v10 = vld [vmem:[%s4494_s0 + $0x250] sm:$0xff] }
  0x67   :  { %594 = vmatmul.mubr.f32.gmra.mxu1 %v2994_v11  ;;  %481 = vmatmul.mubr.f32.gmra.mxu0 %v3000_v12 }
  0x68   :  { %662 = vmatprep.subr.mxu1 %v180_v14  ;;  %743 = vmatprep.subr.mxu0 %v292_v15  ;;  %v342_v14 = vld [vmem:[%s4494_s0 + $0x950] sm:$0xff]  ;;  %v112_v15 = vld [vmem:[%s4494_s0 + $0x220] sm:$0xff] }
  0x69   :  { %663 = vmatpush2.msra.mxu1 %v179_v18  ;;  %744 = vmatpush1.msra.mxu0 %v291_v19  ;;  %v336_v18 = vld [vmem:[%s4494_s0 + $0x920] sm:$0xff]  ;;  %v111_v19 = vld [vmem:[%s4494_s0 + $0x218] sm:$0xff] }
  0x6a   :  { %664 = vmatprep.subr.mxu1 %v173_v20  ;;  %745 = vmatprep.subr.mxu0 %v285_v21  ;;  %v335_v20 = vld [vmem:[%s4494_s0 + $0x918] sm:$0xff]  ;;  %v105_v21 = vld [vmem:[%s4494_s0 + $0x1e8] sm:$0xff] }
  0x6b   :  { %486 = vmatprep.mubr.f32.mxu0 %v3026_v22  ;;  %599 = vmatprep.mubr.f32.mxu1 %v2312_v3 }
  0x6c   :  { %665 = vmatpush2.msra.mxu1 %v172_v23  ;;  %746 = vmatpush1.msra.mxu0 %v284_v25  ;;  %v329_v23 = vld [vmem:[%s4494_s0 + $0x8e8] sm:$0xff]  ;;  %v104_v25 = vld [vmem:[%s4494_s0 + $0x1e0] sm:$0xff] }
  0x6d   :  { %600 = vmatmul.mubr.f32.gmra.mxu1 %v3037_v26  ;;  %487 = vmatmul.mubr.f32.gmra.mxu0 %v3043_v29 }
  0x6e   :  { %666 = vmatprep.subr.mxu1 %v166_v30  ;;  %747 = vmatprep.subr.mxu0 %v278_v31  ;;  %v328_v30 = vld [vmem:[%s4494_s0 + $0x8e0] sm:$0xff]  ;;  %v98_v31 = vld [vmem:[%s4494_s0 + $0x1b0] sm:$0xff] }
  0x6f   :  { %667 = vmatpush2.msra.mxu1 %v165_v32  ;;  %748 = vmatpush1.msra.mxu0 %v277_v33  ;;  %v322_v32 = vld [vmem:[%s4494_s0 + $0x8b0] sm:$0xff]  ;;  %v97_v33 = vld [vmem:[%s4494_s0 + $0x1a8] sm:$0xff] }
  0x70   :  { %668 = vmatprep.subr.mxu1 %v159_v34  ;;  %749 = vmatprep.subr.mxu0 %v271_v36  ;;  %v321_v34 = vld [vmem:[%s4494_s0 + $0x8a8] sm:$0xff]  ;;  %v91_v36 = vld [vmem:[%s4494_s0 + $0x178] sm:$0xff] }
  0x71   :  { %669 = vmatpush2.msra.mxu1 %v158_v37  ;;  %670 = vmatprep.mubr.f32.mxu1 %v2735_v2  ;;  %v315_v37 = vld [vmem:[%s4494_s0 + $0x878] sm:$0xff] }
  0x72   :  { %750 = vmatpush1.msra.mxu0 %v270_v40  ;;  %783 = vmatprep.mubr.f32.mxu0 %v2312_v3  ;;  %v90_v40 = vld [vmem:[%s4494_s0 + $0x170] sm:$0xff] }
  0x73   :  { %671 = vmatmul.mubr.f32.vlgmr.msra.gmra.mxu1 %v2743_v6  ;;  %784 = vmatmul.mubr.f32.vlgmr.msra.gmra.mxu0 %v2549_v5 }
  0x74   :  { %832 = vmatprep.subr.mxu0 %v154_v41  ;;  %945 = vmatprep.subr.mxu1 %v378_v42  ;;  %v314_v41 = vld [vmem:[%s4494_s0 + $0x870] sm:$0xff]  ;;  %v84_v42 = vld [vmem:[%s4494_s0 + $0x140] sm:$0xff] }
  0x75   :  { %833 = vmatpush1.msra.mxu0 %v153_v43  ;;  %946 = vmatpush1.msra.mxu1 %v377_v44  ;;  %v308_v43 = vld [vmem:[%s4494_s0 + $0x840] sm:$0xff]  ;;  %v83_v44 = vld [vmem:[%s4494_s0 + $0x138] sm:$0xff] }
  0x76   :  { %834 = vmatprep.subr.mxu0 %v147_v45  ;;  %947 = vmatprep.subr.mxu1 %v371_v47  ;;  %v307_v45 = vld [vmem:[%s4494_s0 + $0x838] sm:$0xff]  ;;  %v77_v47 = vld [vmem:[%s4494_s0 + $0x108] sm:$0xff] }
  0x77   :  { %676 = vmatprep.mubr.f32.mxu1 %v2768_v13  ;;  %789 = vmatprep.mubr.f32.mxu0 %v2312_v3 }
  0x78   :  { %835 = vmatpush1.msra.mxu0 %v146_v48  ;;  %948 = vmatpush1.msra.mxu1 %v370_v51  ;;  %v301_v48 = vld [vmem:[%s4494_s0 + $0x808] sm:$0xff]  ;;  %v76_v51 = vld [vmem:[%s4494_s0 + $0x100] sm:$0xff] }
  0x79   :  { %790 = vmatmul.mubr.f32.gmra.mxu0 %v2779_v16  ;;  %677 = vmatmul.mubr.f32.gmra.mxu1 %v2785_v17 }
  0x7a   :  { %836 = vmatprep.subr.mxu0 %v140_v52  ;;  %949 = vmatprep.subr.mxu1 %v364_v53  ;;  %v300_v52 = vld [vmem:[%s4494_s0 + $0x800] sm:$0xff]  ;;  %v70_v53 = vld [vmem:[%s4494_s0 + $0xd0] sm:$0xff] }
  0x7b   :  { %837 = vmatpush1.msra.mxu0 %v139_v54  ;;  %950 = vmatpush1.msra.mxu1 %v363_v55  ;;  %v294_v54 = vld [vmem:[%s4494_s0 + $0x7d0] sm:$0xff]  ;;  %v69_v55 = vld [vmem:[%s4494_s0 + $0xc8] sm:$0xff] }
  0x7c   :  { %838 = vmatprep.subr.mxu0 %v133_v56  ;;  %951 = vmatprep.subr.mxu1 %v357_v58  ;;  %v293_v56 = vld [vmem:[%s4494_s0 + $0x7c8] sm:$0xff]  ;;  %v63_v58 = vld [vmem:[%s4494_s0 + $0x98] sm:$0xff] }
  0x7d   :  { %682 = vmatprep.mubr.f32.mxu1 %v2811_v24  ;;  %795 = vmatprep.mubr.f32.mxu0 %v2312_v3 }
  0x7e   :  { %839 = vmatpush1.msra.mxu0 %v132_v59  ;;  %952 = vmatpush1.msra.mxu1 %v356_v62  ;;  %v287_v59 = vld [vmem:[%s4494_s0 + $0x798] sm:$0xff]  ;;  %v62_v62 = vld [vmem:[%s4494_s0 + $0x90] sm:$0xff] }
  0x7f   :  { %796 = vmatmul.mubr.f32.gmra.mxu0 %v2822_v27  ;;  %683 = vmatmul.mubr.f32.gmra.mxu1 %v2828_v28 }
  0x80   :  { %840 = vmatprep.subr.mxu0 %v126_v63  ;;  %953 = vmatprep.subr.mxu1 %v350_v0  ;;  %v286_v63 = vld [vmem:[%s4494_s0 + $0x790] sm:$0xff]  ;;  %v56_v0 = vld [vmem:[%s4494_s0 + $0x60] sm:$0xff] }
  0x81   :  { %841 = vmatpush1.msra.mxu0 %v125_v1  ;;  %954 = vmatpush1.msra.mxu1 %v349_v4  ;;  %v280_v1 = vld [vmem:[%s4494_s0 + $0x760] sm:$0xff]  ;;  %v55_v4 = vld [vmem:[%s4494_s0 + $0x58] sm:$0xff] }
  0x82   :  { %842 = vmatprep.subr.mxu0 %v119_v7  ;;  %955 = vmatprep.subr.mxu1 %v343_v9  ;;  %v279_v7 = vld [vmem:[%s4494_s0 + $0x758] sm:$0xff]  ;;  %v49_v9 = vld [vmem:[%s4494_s0 + $0x28] sm:$0xff] }
  0x83   :  { %688 = vmatprep.mubr.f32.mxu1 %v2854_v35  ;;  %801 = vmatprep.mubr.f32.mxu0 %v2312_v3 }
  0x84   :  { %843 = vmatpush1.msra.mxu0 %v118_v10  ;;  %956 = vmatpush1.msra.mxu1 %v342_v14  ;;  %v273_v10 = vld [vmem:[%s4494_s0 + $0x728] sm:$0xff]  ;;  %v48_v14 = vld [vmem:[%s4494_s0 + $0x20] sm:$0xff] }
  0x85   :  { %802 = vmatmul.mubr.f32.gmra.mxu0 %v2865_v38  ;;  %689 = vmatmul.mubr.f32.gmra.mxu1 %v2871_v39 }
  0x86   :  { %844 = vmatprep.subr.mxu0 %v112_v15  ;;  %957 = vmatprep.subr.mxu1 %v336_v18  ;;  %v272_v15 = vld [vmem:[%s4494_s0 + $0x720] sm:$0xff]  ;;  %v266_v18 = vld [vmem:[%s4494_s0 + $0x6f0] sm:$0xff] }
  0x87   :  { %845 = vmatpush1.msra.mxu0 %v111_v19  ;;  %958 = vmatpush1.msra.mxu1 %v335_v20  ;;  %v267_v19 = vld [vmem:[%s4494_s0 + $0x6f8] sm:$0xff]  ;;  %v265_v20 = vld [vmem:[%s4494_s0 + $0x6e8] sm:$0xff] }
  0x88   :  { %846 = vmatprep.subr.mxu0 %v105_v21  ;;  %959 = vmatprep.subr.mxu1 %v329_v23  ;;  %v155_v21 = vld [vmem:[%s4494_s0 + $0x378] sm:$0xff] }
  0x89   :  { %694 = vmatprep.mubr.f32.mxu1 %v2897_v46  ;;  %807 = vmatprep.mubr.f32.mxu0 %v2312_v3  ;;  %v259_v23 = vld [vmem:[%s4494_s0 + $0x6b8] sm:$0xff] }
  0x8a   :  { %847 = vmatpush1.msra.mxu0 %v104_v25  ;;  %960 = vmatpush1.msra.mxu1 %v328_v30  ;;  %v260_v25 = vld [vmem:[%s4494_s0 + $0x6c0] sm:$0xff]  ;;  %v258_v30 = vld [vmem:[%s4494_s0 + $0x6b0] sm:$0xff] }
  0x8b   :  { %808 = vmatmul.mubr.f32.gmra.mxu0 %v2908_v49  ;;  %695 = vmatmul.mubr.f32.gmra.mxu1 %v2914_v50 }
  0x8c   :  { %848 = vmatprep.subr.mxu0 %v98_v31  ;;  %961 = vmatprep.subr.mxu1 %v322_v32  ;;  %v148_v31 = vld [vmem:[%s4494_s0 + $0x340] sm:$0xff]  ;;  %v253_v32 = vld [vmem:[%s4494_s0 + $0x688] sm:$0xff] }
  0x8d   :  { %849 = vmatpush1.msra.mxu0 %v97_v33  ;;  %962 = vmatpush1.msra.mxu1 %v321_v34  ;;  %v251_v33 = vld [vmem:[%s4494_s0 + $0x678] sm:$0xff]  ;;  %v141_v34 = vld [vmem:[%s4494_s0 + $0x308] sm:$0xff] }
  0x8e   :  { %850 = vmatprep.subr.mxu0 %v91_v36  ;;  %963 = vmatprep.subr.mxu1 %v315_v37  ;;  %v245_v36 = vld [vmem:[%s4494_s0 + $0x648] sm:$0xff]  ;;  %v246_v37 = vld [vmem:[%s4494_s0 + $0x650] sm:$0xff] }
  0x8f   :  { %700 = vmatprep.mubr.f32.mxu1 %v2940_v57  ;;  %813 = vmatprep.mubr.f32.mxu0 %v2312_v3 }
  0x90   :  { %851 = vmatpush1.msra.mxu0 %v90_v40  ;;  %964 = vmatpush1.msra.mxu1 %v314_v41  ;;  %v244_v40 = vld [vmem:[%s4494_s0 + $0x640] sm:$0xff]  ;;  %v134_v41 = vld [vmem:[%s4494_s0 + $0x2d0] sm:$0xff] }
  0x91   :  { %814 = vmatmul.mubr.f32.gmra.mxu0 %v2951_v60  ;;  %701 = vmatmul.mubr.f32.gmra.mxu1 %v2957_v61 }
  0x92   :  { %852 = vmatprep.subr.mxu0 %v84_v42  ;;  %965 = vmatprep.subr.mxu1 %v308_v43  ;;  %v239_v42 = vld [vmem:[%s4494_s0 + $0x618] sm:$0xff]  ;;  %v237_v43 = vld [vmem:[%s4494_s0 + $0x608] sm:$0xff] }
  0x93   :  { %853 = vmatpush1.msra.mxu0 %v83_v44  ;;  %966 = vmatpush1.msra.mxu1 %v307_v45  ;;  %v127_v44 = vld [vmem:[%s4494_s0 + $0x298] sm:$0xff] }
  0x94   :  { %854 = vmatprep.subr.mxu0 %v77_v47  ;;  %967 = vmatprep.subr.mxu1 %v301_v48  ;;  %v231_v45 = vld [vmem:[%s4494_s0 + $0x5d8] sm:$0xff]  ;;  %v232_v47 = vld [vmem:[%s4494_s0 + $0x5e0] sm:$0xff]  ;;  %v230_v48 = vld [vmem:[%s4494_s0 + $0x5d0] sm:$0xff] }
  0x95   :  { %706 = vmatprep.mubr.f32.mxu1 %v2983_v8  ;;  %819 = vmatprep.mubr.f32.mxu0 %v2312_v3 }
  0x96   :  { %855 = vmatpush1.msra.mxu0 %v76_v51  ;;  %968 = vmatpush1.msra.mxu1 %v300_v52  ;;  %v120_v51 = vld [vmem:[%s4494_s0 + $0x260] sm:$0xff]  ;;  %v225_v52 = vld [vmem:[%s4494_s0 + $0x5a8] sm:$0xff] }
  0x97   :  { %820 = vmatmul.mubr.f32.gmra.mxu0 %v2994_v11  ;;  %707 = vmatmul.mubr.f32.gmra.mxu1 %v3000_v12 }
  0x98   :  { %856 = vmatprep.subr.mxu0 %v70_v53  ;;  %969 = vmatprep.subr.mxu1 %v294_v54  ;;  %v223_v53 = vld [vmem:[%s4494_s0 + $0x598] sm:$0xff]  ;;  %v113_v54 = vld [vmem:[%s4494_s0 + $0x228] sm:$0xff] }
  0x99   :  { %857 = vmatpush1.msra.mxu0 %v69_v55  ;;  %970 = vmatpush1.msra.mxu1 %v293_v56  ;;  %v217_v55 = vld [vmem:[%s4494_s0 + $0x568] sm:$0xff]  ;;  %v218_v56 = vld [vmem:[%s4494_s0 + $0x570] sm:$0xff] }
  0x9a   :  { %858 = vmatprep.subr.mxu0 %v63_v58  ;;  %971 = vmatprep.subr.mxu1 %v287_v59  ;;  %v216_v58 = vld [vmem:[%s4494_s0 + $0x560] sm:$0xff]  ;;  %v106_v59 = vld [vmem:[%s4494_s0 + $0x1f0] sm:$0xff] }
  0x9b   :  { %712 = vmatprep.mubr.f32.mxu1 %v3026_v22  ;;  %825 = vmatprep.mubr.f32.mxu0 %v2312_v3 }
  0x9c   :  { %859 = vmatpush1.msra.mxu0 %v62_v62  ;;  %972 = vmatpush1.msra.mxu1 %v286_v63  ;;  %v211_v62 = vld [vmem:[%s4494_s0 + $0x538] sm:$0xff]  ;;  %v209_v63 = vld [vmem:[%s4494_s0 + $0x528] sm:$0xff] }
  0x9d   :  { %826 = vmatmul.mubr.f32.gmra.mxu0 %v3037_v26  ;;  %713 = vmatmul.mubr.f32.gmra.mxu1 %v3043_v29 }
  0x9e   :  { %860 = vmatprep.subr.mxu0 %v56_v0  ;;  %973 = vmatprep.subr.mxu1 %v280_v1  ;;  %v99_v0 = vld [vmem:[%s4494_s0 + $0x1b8] sm:$0xff] }
  0x9f   :  { %861 = vmatpush1.msra.mxu0 %v55_v4  ;;  %974 = vmatpush1.msra.mxu1 %v279_v7  ;;  %v203_v1 = vld [vmem:[%s4494_s0 + $0x4f8] sm:$0xff]  ;;  %v204_v4 = vld [vmem:[%s4494_s0 + $0x500] sm:$0xff]  ;;  %v202_v7 = vld [vmem:[%s4494_s0 + $0x4f0] sm:$0xff] }
  0xa0   :  { %862 = vmatprep.subr.mxu0 %v49_v9  ;;  %975 = vmatprep.subr.mxu1 %v273_v10  ;;  %v92_v9 = vld [vmem:[%s4494_s0 + $0x180] sm:$0xff] }
  0xa1   :  { %863 = vmatpush1.msra.mxu0 %v48_v14  ;;  %976 = vmatpush1.msra.mxu1 %v272_v15  ;;  %v196_v10 = vld [vmem:[%s4494_s0 + $0x4c0] sm:$0xff]  ;;  %v197_v14 = vld [vmem:[%s4494_s0 + $0x4c8] sm:$0xff]  ;;  %v195_v15 = vld [vmem:[%s4494_s0 + $0x4b8] sm:$0xff] }
  0xa2   :  { %1009 = vmatprep.mubr.f32.mxu1 %v2312_v3  ;;  %864 = vmatprep.subr.mxu0 %v266_v18  ;;  %v85_v18 = vld [vmem:[%s4494_s0 + $0x148] sm:$0xff] }
  0xa3   :  { %1010 = vmatmul.mubr.f32.vlgmr.msra.gmra.mxu1 %v2549_v5  ;;  %2089 = vmatprep.subr.mxu1 %v267_v19  ;;  %v252_v5 = vld [vmem:[%s4494_s0 + $0x680] sm:$0xff]  ;;  %v189_v19 = vld [vmem:[%s4494_s0 + $0x488] sm:$0xff] }
  0xa4   :  { %865 = vmatpush2.msra.mxu0 %v265_v20  ;;  %2090 = vmatpush3.msra.mxu1 %v155_v21  ;;  %v190_v20 = vld [vmem:[%s4494_s0 + $0x490] sm:$0xff]  ;;  %v188_v21 = vld [vmem:[%s4494_s0 + $0x480] sm:$0xff] }
  0xa5   :  { %866 = vmatprep.subr.mxu0 %v259_v23  ;;  %2091 = vmatprep.subr.mxu1 %v260_v25  ;;  %v78_v23 = vld [vmem:[%s4494_s0 + $0x110] sm:$0xff] }
  0xa6   :  { %867 = vmatpush2.msra.mxu0 %v258_v30  ;;  %1015 = vmatprep.mubr.f32.mxu1 %v2312_v3  ;;  %v182_v25 = vld [vmem:[%s4494_s0 + $0x450] sm:$0xff]  ;;  %v183_v30 = vld [vmem:[%s4494_s0 + $0x458] sm:$0xff] }
  0xa7   :  { %2092 = vmatpush3.msra.mxu1 %v148_v31  ;;  %868 = vmatprep.subr.mxu0 %v252_v5  ;;  %v181_v31 = vld [vmem:[%s4494_s0 + $0x448] sm:$0xff]  ;;  %v71_v5 = vld [vmem:[%s4494_s0 + $0xd8] sm:$0xff] }
  0xa8   :  { %1016 = vmatmul.mubr.f32.gmra.mxu1 %v2779_v16  ;;  %2093 = vmatprep.subr.mxu1 %v253_v32  ;;  %v238_v16 = vld [vmem:[%s4494_s0 + $0x610] sm:$0xff]  ;;  %v175_v32 = vld [vmem:[%s4494_s0 + $0x418] sm:$0xff] }
  0xa9   :  { %869 = vmatpush2.msra.mxu0 %v251_v33  ;;  %2094 = vmatpush3.msra.mxu1 %v141_v34  ;;  %v176_v33 = vld [vmem:[%s4494_s0 + $0x420] sm:$0xff]  ;;  %v174_v34 = vld [vmem:[%s4494_s0 + $0x410] sm:$0xff] }
  0xaa   :  { %870 = vmatprep.subr.mxu0 %v245_v36  ;;  %2095 = vmatprep.subr.mxu1 %v246_v37  ;;  %v64_v36 = vld [vmem:[%s4494_s0 + $0xa0] sm:$0xff] }
  0xab   :  { %871 = vmatpush2.msra.mxu0 %v244_v40  ;;  %1021 = vmatprep.mubr.f32.mxu1 %v2312_v3  ;;  %v168_v37 = vld [vmem:[%s4494_s0 + $0x3e0] sm:$0xff]  ;;  %v169_v40 = vld [vmem:[%s4494_s0 + $0x3e8] sm:$0xff] }
  0xac   :  { %2096 = vmatpush3.msra.mxu1 %v134_v41  ;;  %872 = vmatprep.subr.mxu0 %v238_v16  ;;  %v167_v41 = vld [vmem:[%s4494_s0 + $0x3d8] sm:$0xff]  ;;  %v57_v16 = vld [vmem:[%s4494_s0 + $0x68] sm:$0xff] }
  0xad   :  { %1022 = vmatmul.mubr.f32.gmra.mxu1 %v2822_v27  ;;  %2097 = vmatprep.subr.mxu1 %v239_v42  ;;  %v224_v27 = vld [vmem:[%s4494_s0 + $0x5a0] sm:$0xff]  ;;  %v161_v42 = vld [vmem:[%s4494_s0 + $0x3a8] sm:$0xff] }
  0xae   :  { %873 = vmatpush2.msra.mxu0 %v237_v43  ;;  %2098 = vmatpush3.msra.mxu1 %v127_v44  ;;  %v162_v43 = vld [vmem:[%s4494_s0 + $0x3b0] sm:$0xff] }
  0xaf   :  { %874 = vmatprep.subr.mxu0 %v231_v45  ;;  %2099 = vmatprep.subr.mxu1 %v232_v47  ;;  %v50_v44 = vld [vmem:[%s4494_s0 + $0x30] sm:$0xff]  ;;  %v379_v45 = vld [vmem:[%s4494_s0 + $0xa78] sm:$0xff]  ;;  %v372_v47 = vld [vmem:[%s4494_s0 + $0xa40] sm:$0xff] }
  0xb0   :  { %875 = vmatpush2.msra.mxu0 %v230_v48  ;;  %1027 = vmatprep.mubr.f32.mxu1 %v2312_v3  ;;  %v2266_v48 = vld [vmem:[%s4495_s1 + $0x28] sm:$0xff] }
  0xb1   :  { %2100 = vmatpush3.msra.mxu1 %v120_v51  ;;  %876 = vmatprep.subr.mxu0 %v224_v27  ;;  %v2268_v51 = vld [vmem:[%s4495_s1 + $0x58] sm:$0xff] }
  0xb2   :  { %1028 = vmatmul.mubr.f32.gmra.mxu1 %v2865_v38  ;;  %2101 = vmatprep.subr.mxu1 %v225_v52  ;;  %v210_v38 = vld [vmem:[%s4494_s0 + $0x530] sm:$0xff] }
  0xb3   :  { %877 = vmatpush2.msra.mxu0 %v223_v53  ;;  %2102 = vmatpush3.msra.mxu1 %v113_v54 }
  0xb4   :  { %878 = vmatprep.subr.mxu0 %v217_v55  ;;  %2103 = vmatprep.subr.mxu1 %v218_v56 }
  0xb5   :  { %879 = vmatpush2.msra.mxu0 %v216_v58  ;;  %1033 = vmatprep.mubr.f32.mxu1 %v2312_v3 }
  0xb6   :  { %2104 = vmatpush3.msra.mxu1 %v106_v59  ;;  %880 = vmatprep.subr.mxu0 %v210_v38 }
  0xb7   :  { %1034 = vmatmul.mubr.f32.gmra.mxu1 %v2908_v49  ;;  %2105 = vmatprep.subr.mxu1 %v211_v62 }
  0xb8   :  { %881 = vmatpush2.msra.mxu0 %v209_v63  ;;  %2106 = vmatpush3.msra.mxu1 %v99_v0 }
  0xb9   :  { %882 = vmatprep.subr.mxu0 %v203_v1  ;;  %2107 = vmatprep.subr.mxu1 %v204_v4 }
  0xba   :  { %883 = vmatpush2.msra.mxu0 %v202_v7  ;;  %1039 = vmatprep.mubr.f32.mxu1 %v2312_v3 }
  0xbb   :  { %2108 = vmatpush3.msra.mxu1 %v92_v9  ;;  %884 = vmatprep.subr.mxu0 %v196_v10 }
  0xbc   :  { %1040 = vmatmul.mubr.f32.gmra.mxu1 %v2951_v60  ;;  %2109 = vmatprep.subr.mxu1 %v197_v14 }
  0xbd   :  { %885 = vmatpush2.msra.mxu0 %v195_v15  ;;  %2110 = vmatpush3.msra.mxu1 %v85_v18 }
  0xbe   :  { %886 = vmatprep.subr.mxu0 %v189_v19  ;;  %2111 = vmatprep.subr.mxu1 %v190_v20 }
  0xbf   :  { %887 = vmatpush2.msra.mxu0 %v188_v21  ;;  %1045 = vmatprep.mubr.f32.mxu1 %v2312_v3 }
  0xc0   :  { %2112 = vmatpush3.msra.mxu1 %v78_v23  ;;  %888 = vmatprep.subr.mxu0 %v182_v25 }
  0xc1   :  { %1046 = vmatmul.mubr.f32.gmra.mxu1 %v2994_v11  ;;  %2113 = vmatprep.subr.mxu1 %v183_v30 }
  0xc2   :  { %889 = vmatpush2.msra.mxu0 %v181_v31  ;;  %2114 = vmatpush3.msra.mxu1 %v71_v5 }
  0xc3   :  { %890 = vmatprep.subr.mxu0 %v175_v32  ;;  %2115 = vmatprep.subr.mxu1 %v176_v33 }
  0xc4   :  { %891 = vmatpush2.msra.mxu0 %v174_v34  ;;  %1051 = vmatprep.mubr.f32.mxu1 %v2312_v3  ;;  %v160_v3 = vld [vmem:[%s4494_s0 + $0x3a0] sm:$0xff] }
  0xc5   :  { %2116 = vmatpush3.msra.mxu1 %v64_v36  ;;  %892 = vmatprep.subr.mxu0 %v168_v37 }
  0xc6   :  { %1052 = vmatmul.mubr.f32.gmra.mxu1 %v3037_v26  ;;  %2117 = vmatprep.subr.mxu1 %v169_v40 }
  0xc7   :  { %893 = vmatpush2.msra.mxu0 %v167_v41  ;;  %2118 = vmatpush3.msra.mxu1 %v57_v16 }
  0xc8   :  { %894 = vmatprep.subr.mxu0 %v161_v42  ;;  %2119 = vmatprep.subr.mxu1 %v162_v43 }
  0xc9   :  { %895 = vmatpush2.msra.mxu0 %v160_v3  ;;  %896 = vmatprep.mubr.f32.mxu0 %v2735_v2 }
  0xca   :  { %2120 = vmatpush3.msra.mxu1 %v50_v44  ;;  %1122 = vmatprep.mubr.f32.mxu1 %v2735_v2  ;;  %v365_v2 = vld [vmem:[%s4494_s0 + $0xa08] sm:$0xff] }
  0xcb   :  { %897 = vmatmul.mubr.f32.vlgmr.msra.gmra.mxu0 %v2743_v6  ;;  %1123 = vmatmul.mubr.f32.vlgmr.msra.gmra.mxu1 %v2743_v6  ;;  %v358_v6 = vld [vmem:[%s4494_s0 + $0x9d0] sm:$0xff] }
  0xcc   :  { %2169 = vmatprep.subr.mxu0 %v379_v45  ;;  %2213 = vmatprep.subr.mxu1 %v379_v45 }
  0xcd   :  { %2170 = vmatpush3.msra.mxu0 %v379_v45  ;;  %2229 = vmatpush3.msra.mxu1 %v379_v45 }
  0xce   :  { %2171 = vmatprep.subr.mxu0 %v372_v47  ;;  %2214 = vmatprep.subr.mxu1 %v372_v47 }
  0xcf   :  { %902 = vmatprep.mubr.f32.mxu0 %v2768_v13  ;;  %1127 = vmatprep.mubr.f32.mxu1 %v2768_v13  ;;  %v351_v13 = vld [vmem:[%s4494_s0 + $0x998] sm:$0xff] }
  0xd0   :  { %2172 = vmatpush3.msra.mxu0 %v372_v47  ;;  %2230 = vmatpush3.msra.mxu1 %v372_v47 }
  0xd1   :  { %903 = vmatmul.mubr.f32.gmra.mxu0 %v2785_v17  ;;  %1128 = vmatmul.mubr.f32.gmra.mxu1 %v2785_v17  ;;  %v344_v17 = vld [vmem:[%s4494_s0 + $0x960] sm:$0xff] }
  0xd2   :  { %2173 = vmatprep.subr.mxu0 %v365_v2  ;;  %2215 = vmatprep.subr.mxu1 %v365_v2 }
  0xd3   :  { %2174 = vmatpush3.msra.mxu0 %v365_v2  ;;  %2231 = vmatpush3.msra.mxu1 %v365_v2 }
  0xd4   :  { %2175 = vmatprep.subr.mxu0 %v358_v6  ;;  %2216 = vmatprep.subr.mxu1 %v358_v6 }
  0xd5   :  { %908 = vmatprep.mubr.f32.mxu0 %v2811_v24  ;;  %1132 = vmatprep.mubr.f32.mxu1 %v2811_v24  ;;  %v337_v24 = vld [vmem:[%s4494_s0 + $0x928] sm:$0xff] }
  0xd6   :  { %2176 = vmatpush3.msra.mxu0 %v358_v6  ;;  %2232 = vmatpush3.msra.mxu1 %v358_v6 }
  0xd7   :  { %909 = vmatmul.mubr.f32.gmra.mxu0 %v2828_v28  ;;  %1133 = vmatmul.mubr.f32.gmra.mxu1 %v2828_v28  ;;  %v330_v28 = vld [vmem:[%s4494_s0 + $0x8f0] sm:$0xff] }
  0xd8   :  { %2177 = vmatprep.subr.mxu0 %v351_v13  ;;  %2217 = vmatprep.subr.mxu1 %v351_v13 }
  0xd9   :  { %2178 = vmatpush3.msra.mxu0 %v351_v13  ;;  %2233 = vmatpush3.msra.mxu1 %v351_v13 }
  0xda   :  { %2179 = vmatprep.subr.mxu0 %v344_v17  ;;  %2218 = vmatprep.subr.mxu1 %v344_v17 }
  0xdb   :  { %914 = vmatprep.mubr.f32.mxu0 %v2854_v35  ;;  %1137 = vmatprep.mubr.f32.mxu1 %v2854_v35  ;;  %v323_v35 = vld [vmem:[%s4494_s0 + $0x8b8] sm:$0xff] }
  0xdc   :  { %2180 = vmatpush3.msra.mxu0 %v344_v17  ;;  %2234 = vmatpush3.msra.mxu1 %v344_v17 }
  0xdd   :  { %915 = vmatmul.mubr.f32.gmra.mxu0 %v2871_v39  ;;  %1138 = vmatmul.mubr.f32.gmra.mxu1 %v2871_v39  ;;  %v316_v39 = vld [vmem:[%s4494_s0 + $0x880] sm:$0xff] }
  0xde   :  { %2181 = vmatprep.subr.mxu0 %v337_v24  ;;  %2219 = vmatprep.subr.mxu1 %v337_v24 }
  0xdf   :  { %2182 = vmatpush3.msra.mxu0 %v337_v24  ;;  %2235 = vmatpush3.msra.mxu1 %v337_v24 }
  0xe0   :  { %2183 = vmatprep.subr.mxu0 %v330_v28  ;;  %2220 = vmatprep.subr.mxu1 %v330_v28 }
  0xe1   :  { %920 = vmatprep.mubr.f32.mxu0 %v2897_v46  ;;  %1142 = vmatprep.mubr.f32.mxu1 %v2897_v46  ;;  %v309_v46 = vld [vmem:[%s4494_s0 + $0x848] sm:$0xff] }
  0xe2   :  { %2184 = vmatpush3.msra.mxu0 %v330_v28  ;;  %2236 = vmatpush3.msra.mxu1 %v330_v28 }
  0xe3   :  { %921 = vmatmul.mubr.f32.gmra.mxu0 %v2914_v50  ;;  %1143 = vmatmul.mubr.f32.gmra.mxu1 %v2914_v50  ;;  %v302_v50 = vld [vmem:[%s4494_s0 + $0x810] sm:$0xff] }
  0xe4   :  { %2185 = vmatprep.subr.mxu0 %v323_v35  ;;  %2221 = vmatprep.subr.mxu1 %v323_v35 }
  0xe5   :  { %2186 = vmatpush3.msra.mxu0 %v323_v35  ;;  %2237 = vmatpush3.msra.mxu1 %v323_v35 }
  0xe6   :  { %2187 = vmatprep.subr.mxu0 %v316_v39  ;;  %2222 = vmatprep.subr.mxu1 %v316_v39 }
  0xe7   :  { %926 = vmatprep.mubr.f32.mxu0 %v2940_v57  ;;  %1147 = vmatprep.mubr.f32.mxu1 %v2940_v57  ;;  %v295_v57 = vld [vmem:[%s4494_s0 + $0x7d8] sm:$0xff] }
  0xe8   :  { %2188 = vmatpush3.msra.mxu0 %v316_v39  ;;  %2238 = vmatpush3.msra.mxu1 %v316_v39 }
  0xe9   :  { %927 = vmatmul.mubr.f32.gmra.mxu0 %v2957_v61  ;;  %1148 = vmatmul.mubr.f32.gmra.mxu1 %v2957_v61  ;;  %v288_v61 = vld [vmem:[%s4494_s0 + $0x7a0] sm:$0xff] }
  0xea   :  { %2189 = vmatprep.subr.mxu0 %v309_v46  ;;  %2223 = vmatprep.subr.mxu1 %v309_v46 }
  0xeb   :  { %2190 = vmatpush3.msra.mxu0 %v309_v46  ;;  %2239 = vmatpush3.msra.mxu1 %v309_v46 }
  0xec   :  { %2191 = vmatprep.subr.mxu0 %v302_v50  ;;  %2224 = vmatprep.subr.mxu1 %v302_v50 }
  0xed   :  { %932 = vmatprep.mubr.f32.mxu0 %v2983_v8  ;;  %1152 = vmatprep.mubr.f32.mxu1 %v2983_v8  ;;  %v281_v8 = vld [vmem:[%s4494_s0 + $0x768] sm:$0xff] }
  0xee   :  { %2192 = vmatpush3.msra.mxu0 %v302_v50  ;;  %2240 = vmatpush3.msra.mxu1 %v302_v50 }
  0xef   :  { %933 = vmatmul.mubr.f32.gmra.mxu0 %v3000_v12  ;;  %1153 = vmatmul.mubr.f32.gmra.mxu1 %v3000_v12  ;;  %v274_v12 = vld [vmem:[%s4494_s0 + $0x730] sm:$0xff] }
  0xf0   :  { %2193 = vmatprep.subr.mxu0 %v295_v57  ;;  %2225 = vmatprep.subr.mxu1 %v295_v57 }
  0xf1   :  { %2194 = vmatpush3.msra.mxu0 %v295_v57  ;;  %2241 = vmatpush3.msra.mxu1 %v295_v57 }
  0xf2   :  { %2195 = vmatprep.subr.mxu0 %v288_v61  ;;  %2226 = vmatprep.subr.mxu1 %v288_v61 }
  0xf3   :  { %938 = vmatprep.mubr.f32.mxu0 %v3026_v22  ;;  %1157 = vmatprep.mubr.f32.mxu1 %v3026_v22  ;;  %v2265_v22 = vld [vmem:[%s4495_s1 + $0x10] sm:$0xff] }
  0xf4   :  { %2196 = vmatpush3.msra.mxu0 %v288_v61  ;;  %2242 = vmatpush3.msra.mxu1 %v288_v61 }
  0xf5   :  { %939 = vmatmul.mubr.f32.gmra.mxu0 %v3043_v29  ;;  %1158 = vmatmul.mubr.f32.gmra.mxu1 %v3043_v29  ;;  %v2267_v29 = vld [vmem:[%s4495_s1 + $0x40] sm:$0xff] }
  0xf6   :  { %2197 = vmatprep.subr.mxu0 %v281_v8  ;;  %2227 = vmatprep.subr.mxu1 %v281_v8 }
  0xf7   :  { %2198 = vmatpush3.msra.mxu0 %v281_v8  ;;  %2243 = vmatpush3.msra.mxu1 %v281_v8 }
  0xf8   :  { %2199 = vmatprep.subr.mxu0 %v274_v12  ;;  %2228 = vmatprep.subr.mxu1 %v274_v12 }
  0xf9   :  { %2200 = vmatpush3.msra.mxu0 %v274_v12  ;;  %2244 = vmatpush3.msra.mxu1 %v274_v12 }
  0xfa   :  { %2201 = vmatprep.mubr.f32.mxu0 %v2265_v22  ;;  %2207 = vmatprep.mubr.f32.mxu1 %v2908_v49  ;;  %v559_v49 = vpop.f32.mrf.mxu1 }
  0xfb   :  { %2202 = vmatmul.mubr.f32.vlgmr.msra.gmra.mxu0 %v2266_v48  ;;  %2208 = vmatmul.mubr.f32.vlgmr.msra.gmra.mxu1 %v2951_v60 }
  0xfc   :  { %2204 = vmatprep.mubr.f32.mxu0 %v2267_v29  ;;  %2210 = vmatprep.mubr.f32.mxu1 %v2994_v11  ;;  %v561_v53 = vpop.f32.mrf.mxu1 }
  0xff   :  { %2205 = vmatmul.mubr.f32.gmra.mxu0 %v2268_v51  ;;  %2211 = vmatmul.mubr.f32.gmra.mxu1 %v3037_v26 }
 0x103   :  { %v446_v27 = vpop.f32.mrf.mxu0 }
 0x104   :  { %v3600_v52 = vadd.f32 %v559_v49, %v446_v27 }
 0x105   :  { %v448_v60 = vpop.f32.mrf.mxu0 }
 0x106   :  { %1268 = vst [vmem:[#allocation2] sm:$0xff] %v3600_v52  ;;  %v3603_v54 = vadd.f32 %v561_v53, %v448_v60 }
 0x108   :  { %4526 = vst [vmem:[#allocation3_spill] sm:$0xff] %v3603_v54  ;;  %1269 = vst [vmem:[#allocation2 + $0x8] sm:$0xff] %v3603_v54 }
 0x109   :  { %v565_v11 = vpop.f32.mrf.mxu1  ;;  %v452_v55 = vpop.f32.mrf.mxu0 }
 0x10a   :  { %v3606_v56 = vadd.f32 %v565_v11, %v452_v55 }
 0x10b   :  { %v567_v58 = vpop.f32.mrf.mxu1  ;;  %v454_v59 = vpop.f32.mrf.mxu0 }
 0x10c   :  { %1276 = vst [vmem:[#allocation2 + $0x38] sm:$0xff] %v3606_v56  ;;  %v3609_v26 = vadd.f32 %v567_v58, %v454_v59 }
 0x10e   :  { %1277 = vst [vmem:[#allocation2 + $0x40] sm:$0xff] %v3609_v26 }
 0x10f   :  { %v571_v38 = vpop.f32.mrf.mxu1  ;;  %v458_v62 = vpop.f32.mrf.mxu0 }
 0x110   :  { %v3612_v63 = vadd.f32 %v571_v38, %v458_v62 }
 0x111   :  { %v573_v0 = vpop.f32.mrf.mxu1  ;;  %v460_v1 = vpop.f32.mrf.mxu0 }
 0x112   :  { %4527 = vst [vmem:[#allocation4_spill] sm:$0xff] %v3612_v63  ;;  %1283 = vst [vmem:[#allocation2 + $0x70] sm:$0xff] %v3612_v63  ;;  %v3615_v4 = vadd.f32 %v573_v0, %v460_v1 }
 0x114   :  { %4528 = vst [vmem:[#allocation5_spill] sm:$0xff] %v3615_v4  ;;  %1284 = vst [vmem:[#allocation2 + $0x78] sm:$0xff] %v3615_v4 }
 0x115   :  { %v577_v7 = vpop.f32.mrf.mxu1  ;;  %v464_v9 = vpop.f32.mrf.mxu0 }
 0x116   :  { %v3618_v10 = vadd.f32 %v577_v7, %v464_v9 }
 0x117   :  { %v579_v14 = vpop.f32.mrf.mxu1  ;;  %v466_v15 = vpop.f32.mrf.mxu0 }
 0x118   :  { %4529 = vst [vmem:[#allocation6_spill] sm:$0xff] %v3618_v10  ;;  %1290 = vst [vmem:[#allocation2 + $0xa8] sm:$0xff] %v3618_v10  ;;  %v3621_v18 = vadd.f32 %v579_v14, %v466_v15 }
 0x11a   :  { %4530 = vst [vmem:[#allocation7_spill] sm:$0xff] %v3621_v18  ;;  %1291 = vst [vmem:[#allocation2 + $0xb0] sm:$0xff] %v3621_v18 }
 0x11b   :  { %v583_v19 = vpop.f32.mrf.mxu1  ;;  %v470_v20 = vpop.f32.mrf.mxu0 }
 0x11c   :  { %v3624_v21 = vadd.f32 %v583_v19, %v470_v20 }
 0x11d   :  { %v585_v23 = vpop.f32.mrf.mxu1  ;;  %v472_v25 = vpop.f32.mrf.mxu0 }
 0x11e   :  { %1297 = vst [vmem:[#allocation2 + $0xe0] sm:$0xff] %v3624_v21  ;;  %v3627_v30 = vadd.f32 %v585_v23, %v472_v25 }
 0x120   :  { %1298 = vst [vmem:[#allocation2 + $0xe8] sm:$0xff] %v3627_v30 }
 0x121   :  { %v589_v31 = vpop.f32.mrf.mxu1  ;;  %v476_v5 = vpop.f32.mrf.mxu0 }
 0x122   :  { %v3630_v32 = vadd.f32 %v589_v31, %v476_v5 }
 0x123   :  { %v591_v33 = vpop.f32.mrf.mxu1  ;;  %v478_v34 = vpop.f32.mrf.mxu0 }
 0x124   :  { %4531 = vst [vmem:[#allocation8_spill] sm:$0xff] %v3630_v32  ;;  %1304 = vst [vmem:[#allocation2 + $0x118] sm:$0xff] %v3630_v32  ;;  %v3633_v36 = vadd.f32 %v591_v33, %v478_v34 }
 0x126   :  { %4532 = vst [vmem:[#allocation9_spill] sm:$0xff] %v3633_v36  ;;  %1305 = vst [vmem:[#allocation2 + $0x120] sm:$0xff] %v3633_v36 }
 0x127   :  { %v595_v37 = vpop.f32.mrf.mxu1  ;;  %v482_v40 = vpop.f32.mrf.mxu0 }
 0x128   :  { %v3636_v41 = vadd.f32 %v595_v37, %v482_v40 }
 0x129   :  { %v597_v16 = vpop.f32.mrf.mxu1  ;;  %v484_v42 = vpop.f32.mrf.mxu0 }
 0x12a   :  { %4533 = vst [vmem:[#allocation10_spill] sm:$0xff] %v3636_v41  ;;  %1311 = vst [vmem:[#allocation2 + $0x150] sm:$0xff] %v3636_v41  ;;  %v3639_v43 = vadd.f32 %v597_v16, %v484_v42 }
 0x12c   :  { %4534 = vst [vmem:[#allocation11_spill] sm:$0xff] %v3639_v43  ;;  %1312 = vst [vmem:[#allocation2 + $0x158] sm:$0xff] %v3639_v43 }
 0x12d   :  { %v601_v3 = vpop.f32.mrf.mxu1  ;;  %v488_v44 = vpop.f32.mrf.mxu0 }
 0x12e   :  { %v3642_v45 = vadd.f32 %v601_v3, %v488_v44 }
 0x12f   :  { %v603_v47 = vpop.f32.mrf.mxu1  ;;  %v490_v2 = vpop.f32.mrf.mxu0 }
 0x130   :  { %4535 = vst [vmem:[#allocation12_spill] sm:$0xff] %v3642_v45  ;;  %1318 = vst [vmem:[#allocation2 + $0x188] sm:$0xff] %v3642_v45  ;;  %v3645_v6 = vadd.f32 %v603_v47, %v490_v2 }
 0x132   :  { %4536 = vst [vmem:[#allocation13_spill] sm:$0xff] %v3645_v6  ;;  %1319 = vst [vmem:[#allocation2 + $0x190] sm:$0xff] %v3645_v6 }
 0x133   :  { %v672_v13 = vpop.f32.mrf.mxu1  ;;  %v785_v17 = vpop.f32.mrf.mxu0 }
 0x134   :  { %v3648_v24 = vadd.f32 %v785_v17, %v672_v13 }
 0x135   :  { %v674_v28 = vpop.f32.mrf.mxu1  ;;  %v787_v35 = vpop.f32.mrf.mxu0 }
 0x136   :  { %4537 = vst [vmem:[#allocation14_spill] sm:$0xff] %v3648_v24  ;;  %1270 = vst [vmem:[#allocation2 + $0x10] sm:$0xff] %v3648_v24  ;;  %v3651_v39 = vadd.f32 %v787_v35, %v674_v28 }
 0x138   :  { %1271 = vst [vmem:[#allocation2 + $0x18] sm:$0xff] %v3651_v39 }
 0x139   :  { %v791_v46 = vpop.f32.mrf.mxu0  ;;  %v678_v50 = vpop.f32.mrf.mxu1 }
 0x13a   :  { %v3654_v57 = vadd.f32 %v791_v46, %v678_v50 }
 0x13b   :  { %v793_v61 = vpop.f32.mrf.mxu0  ;;  %v680_v8 = vpop.f32.mrf.mxu1 }
 0x13c   :  { %1278 = vst [vmem:[#allocation2 + $0x48] sm:$0xff] %v3654_v57  ;;  %v3657_v12 = vadd.f32 %v793_v61, %v680_v8 }
 0x13e   :  { %1279 = vst [vmem:[#allocation2 + $0x50] sm:$0xff] %v3657_v12 }
 0x13f   :  { %v797_v22 = vpop.f32.mrf.mxu0  ;;  %v684_v48 = vpop.f32.mrf.mxu1 }
 0x140   :  { %v3660_v29 = vadd.f32 %v797_v22, %v684_v48 }
 0x141   :  { %v799_v51 = vpop.f32.mrf.mxu0  ;;  %v686_v49 = vpop.f32.mrf.mxu1 }
 0x142   :  { %1285 = vst [vmem:[#allocation2 + $0x80] sm:$0xff] %v3660_v29  ;;  %v3663_v27 = vadd.f32 %v799_v51, %v686_v49 }
 0x144   :  { %4538 = vst [vmem:[#allocation15_spill] sm:$0xff] %v3663_v27  ;;  %1286 = vst [vmem:[#allocation2 + $0x88] sm:$0xff] %v3663_v27 }
 0x145   :  { %v803_v53 = vpop.f32.mrf.mxu0  ;;  %v690_v60 = vpop.f32.mrf.mxu1 }
 0x146   :  { %v3666_v11 = vadd.f32 %v803_v53, %v690_v60 }
 0x147   :  { %v805_v55 = vpop.f32.mrf.mxu0  ;;  %v692_v58 = vpop.f32.mrf.mxu1 }
 0x148   :  { %1292 = vst [vmem:[#allocation2 + $0xb8] sm:$0xff] %v3666_v11  ;;  %v3669_v59 = vadd.f32 %v805_v55, %v692_v58 }
 0x14a   :  { %1293 = vst [vmem:[#allocation2 + $0xc0] sm:$0xff] %v3669_v59 }
 0x14b   :  { %v809_v38 = vpop.f32.mrf.mxu0  ;;  %v696_v62 = vpop.f32.mrf.mxu1 }
 0x14c   :  { %v3672_v0 = vadd.f32 %v809_v38, %v696_v62 }
 0x14d   :  { %v811_v1 = vpop.f32.mrf.mxu0  ;;  %v698_v7 = vpop.f32.mrf.mxu1 }
 0x14e   :  { %1299 = vst [vmem:[#allocation2 + $0xf0] sm:$0xff] %v3672_v0  ;;  %v3675_v9 = vadd.f32 %v811_v1, %v698_v7 }
 0x150   :  { %1300 = vst [vmem:[#allocation2 + $0xf8] sm:$0xff] %v3675_v9 }
 0x151   :  { %v815_v14 = vpop.f32.mrf.mxu0  ;;  %v702_v15 = vpop.f32.mrf.mxu1 }
 0x152   :  { %v3678_v19 = vadd.f32 %v815_v14, %v702_v15 }
 0x153   :  { %v817_v20 = vpop.f32.mrf.mxu0  ;;  %v704_v23 = vpop.f32.mrf.mxu1 }
 0x154   :  { %4539 = vst [vmem:[#allocation16_spill] sm:$0xff] %v3678_v19  ;;  %1306 = vst [vmem:[#allocation2 + $0x128] sm:$0xff] %v3678_v19  ;;  %v3681_v25 = vadd.f32 %v817_v20, %v704_v23 }
 0x156   :  { %1307 = vst [vmem:[#allocation2 + $0x130] sm:$0xff] %v3681_v25 }
 0x157   :  { %v821_v31 = vpop.f32.mrf.mxu0  ;;  %v708_v5 = vpop.f32.mrf.mxu1 }
 0x158   :  { %v3684_v33 = vadd.f32 %v821_v31, %v708_v5 }
 0x159   :  { %v823_v34 = vpop.f32.mrf.mxu0  ;;  %v710_v37 = vpop.f32.mrf.mxu1 }
 0x15a   :  { %1313 = vst [vmem:[#allocation2 + $0x160] sm:$0xff] %v3684_v33  ;;  %v3687_v40 = vadd.f32 %v823_v34, %v710_v37 }
 0x15c   :  { %4540 = vst [vmem:[#allocation17_spill] sm:$0xff] %v3687_v40  ;;  %1314 = vst [vmem:[#allocation2 + $0x168] sm:$0xff] %v3687_v40 }
 0x15d   :  { %v827_v16 = vpop.f32.mrf.mxu0  ;;  %v714_v42 = vpop.f32.mrf.mxu1 }
 0x15e   :  { %v3690_v3 = vadd.f32 %v827_v16, %v714_v42 }
 0x15f   :  { %v829_v44 = vpop.f32.mrf.mxu0  ;;  %v716_v47 = vpop.f32.mrf.mxu1 }
 0x160   :  { %1320 = vst [vmem:[#allocation2 + $0x198] sm:$0xff] %v3690_v3  ;;  %v3693_v2 = vadd.f32 %v829_v44, %v716_v47 }
 0x162   :  { %4541 = vst [vmem:[#allocation18_spill] sm:$0xff] %v3693_v2  ;;  %1321 = vst [vmem:[#allocation2 + $0x1a0] sm:$0xff] %v3693_v2 }
 0x163   :  { %v1011_v13 = vpop.f32.mrf.mxu1 }
 0x165   :  { %v1013_v17 = vpop.f32.mrf.mxu1 }
 0x168   :  { %v1017_v28 = vpop.f32.mrf.mxu1 }
 0x16a   :  { %v1019_v35 = vpop.f32.mrf.mxu1 }
 0x16d   :  { %v1023_v46 = vpop.f32.mrf.mxu1 }
 0x16f   :  { %v1025_v50 = vpop.f32.mrf.mxu1 }
 0x172   :  { %v1029_v61 = vpop.f32.mrf.mxu1 }
 0x174   :  { %v1031_v8 = vpop.f32.mrf.mxu1 }
 0x177   :  { %v1035_v22 = vpop.f32.mrf.mxu1 }
 0x179   :  { %v1037_v48 = vpop.f32.mrf.mxu1 }
 0x17c   :  { %v1041_v51 = vpop.f32.mrf.mxu1 }
 0x17e   :  { %v1043_v49 = vpop.f32.mrf.mxu1 }
 0x181   :  { %v1047_v53 = vpop.f32.mrf.mxu1 }
 0x183   :  { %v1049_v60 = vpop.f32.mrf.mxu1 }
 0x186   :  { %v3696_v55 = vpop.f32.mrf.mxu1 }
 0x188   :  { %v3698_v58 = vpop.f32.mrf.mxu1 }
 0x18b   :  { %v898_v38 = vpop.f32.mrf.mxu0  ;;  %v3702_v1 = vpop.f32.mrf.mxu1 }
 0x18c   :  { %v3700_v62 = vadd.f32 %v1011_v13, %v898_v38 }
 0x18d   :  { %v900_v7 = vpop.f32.mrf.mxu0  ;;  %v3707_v15 = vpop.f32.mrf.mxu1 }
 0x18e   :  { %1272 = vst [vmem:[#allocation2 + $0x20] sm:$0xff] %v3700_v62  ;;  %v3705_v14 = vadd.f32 %v1013_v17, %v900_v7 }
 0x190   :  { %1273 = vst [vmem:[#allocation2 + $0x28] sm:$0xff] %v3705_v14 }
 0x191   :  { %v904_v20 = vpop.f32.mrf.mxu0  ;;  %v3712_v31 = vpop.f32.mrf.mxu1 }
 0x192   :  { %v3710_v23 = vadd.f32 %v1017_v28, %v904_v20 }
 0x193   :  { %v906_v5 = vpop.f32.mrf.mxu0  ;;  %v3716_v37 = vpop.f32.mrf.mxu1 }
 0x194   :  { %v3714_v34 = vadd.f32 %v1019_v35, %v906_v5 }
 0x197   :  { %v910_v16 = vpop.f32.mrf.mxu0  ;;  %v3720_v44 = vpop.f32.mrf.mxu1 }
 0x198   :  { %v3718_v42 = vadd.f32 %v1023_v46, %v910_v16 }
 0x199   :  { %v912_v47 = vpop.f32.mrf.mxu0  ;;  %v3725_v17 = vpop.f32.mrf.mxu1 }
 0x19a   :  { %4542 = vst [vmem:[#allocation19_spill] sm:$0xff] %v3718_v42  ;;  %1287 = vst [vmem:[#allocation2 + $0x90] sm:$0xff] %v3718_v42  ;;  %v3723_v13 = vadd.f32 %v1025_v50, %v912_v47 }
 0x19c   :  { %4543 = vst [vmem:[#allocation20_spill] sm:$0xff] %v3723_v13  ;;  %1288 = vst [vmem:[#allocation2 + $0x98] sm:$0xff] %v3723_v13 }
 0x19d   :  { %v916_v28 = vpop.f32.mrf.mxu0  ;;  %v3730_v35 = vpop.f32.mrf.mxu1 }
 0x19e   :  { %v3728_v38 = vadd.f32 %v1029_v61, %v916_v28 }
 0x19f   :  { %v918_v7 = vpop.f32.mrf.mxu0  ;;  %v3735_v20 = vpop.f32.mrf.mxu1 }
 0x1a0   :  { %1294 = vst [vmem:[#allocation2 + $0xc8] sm:$0xff] %v3728_v38  ;;  %v3733_v46 = vadd.f32 %v1031_v8, %v918_v7 }
 0x1a2   :  { %4544 = vst [vmem:[#allocation21_spill] sm:$0xff] %v3733_v46  ;;  %1295 = vst [vmem:[#allocation2 + $0xd0] sm:$0xff] %v3733_v46 }
 0x1a3   :  { %v922_v50 = vpop.f32.mrf.mxu0  ;;  %v2133_v16 = vpop.f32.mrf.mxu1 }
 0x1a4   :  { %v3738_v5 = vadd.f32 %v1035_v22, %v922_v50  ;;  %v1325_v22 = vadd.f32 %v3603_v54, %v3600_v52 }
 0x1a5   :  { %v924_v47 = vpop.f32.mrf.mxu0  ;;  %v2134_v28 = vpop.f32.mrf.mxu1 }
 0x1a6   :  { %4545 = vst [vmem:[#allocation22_spill] sm:$0xff] %v3738_v5  ;;  %1301 = vst [vmem:[#allocation2 + $0x100] sm:$0xff] %v3738_v5  ;;  %v3741_v61 = vadd.f32 %v1037_v48, %v924_v47  ;;  %v1334_v48 = vadd.f32 %v3609_v26, %v3606_v56 }
 0x1a8   :  { %1302 = vst [vmem:[#allocation2 + $0x108] sm:$0xff] %v3741_v61 }
 0x1a9   :  { %v928_v13 = vpop.f32.mrf.mxu0  ;;  %v2136_v8 = vpop.f32.mrf.mxu1 }
 0x1aa   :  { %v3744_v2 = vadd.f32 %v1041_v51, %v928_v13  ;;  %v1370_v51 = vadd.f32 %v3633_v36, %v3630_v32  ;;  %v1326_v13 = vadd.f32 %v1325_v22, %v3648_v24  ;;  %v1352_v36 = vadd.f32 %v3621_v18, %v3618_v10 }
 0x1ab   :  { %v930_v7 = vpop.f32.mrf.mxu0  ;;  %v2137_v42 = vpop.f32.mrf.mxu1  ;;  %v1361_v22 = vadd.f32 %v3627_v30, %v3624_v21 }
 0x1ac   :  { %v3746_v40 = vadd.f32 %v1043_v49, %v930_v7  ;;  %v1371_v54 = vadd.f32 %v1370_v51, %v3678_v19  ;;  %v1353_v51 = vadd.f32 %v1352_v36, %v3666_v11 }
 0x1ae   :  { %v1372_v18 = vadd.f32 %v1371_v54, %v3681_v25  ;;  %v2126_v54 = vadd.f32 %v3716_v37, %v3712_v31  ;;  %v2135_v37 = vadd.f32 %v2134_v28, %v2133_v16 }
 0x1af   :  { %v934_v46 = vpop.f32.mrf.mxu0  ;;  %v3752_v5 = vpop.f32.mrf.mxu1 }
 0x1b0   :  { %v3750_v50 = vadd.f32 %v1047_v53, %v934_v46  ;;  %v1335_v53 = vadd.f32 %v1334_v48, %v3654_v57  ;;  %v1343_v46 = vadd.f32 %v3615_v4, %v3612_v63  ;;  %v1362_v63 = vadd.f32 %v1361_v22, %v3672_v0 }
 0x1b1   :  { %v936_v47 = vpop.f32.mrf.mxu0  ;;  %v3762_v7 = vpop.f32.mrf.mxu1  ;;  %v1373_v22 = vadd.f32 %v1372_v18, %v3744_v2 }
 0x1b2   :  { %1315 = vst [vmem:[#allocation2 + $0x170] sm:$0xff] %v3750_v50  ;;  %v3760_v49 = vadd.f32 %v1049_v60, %v936_v47  ;;  %v1327_v60 = vadd.f32 %v1326_v13, %v3651_v39  ;;  %v1344_v47 = vadd.f32 %v1343_v46, %v3660_v29  ;;  %v1336_v4 = vadd.f32 %v1335_v53, %v3657_v12 }
 0x1b4   :  { %1316 = vst [vmem:[#allocation2 + $0x178] sm:$0xff] %v3760_v49  ;;  %v1328_v10 = vadd.f32 %v1327_v60, %v3700_v62  ;;  %v1337_v36 = vadd.f32 %v1336_v4, %v3710_v23  ;;  %v1345_v53 = vadd.f32 %v1344_v47, %v3663_v27  ;;  %v2123_v47 = vadd.f32 %v3707_v15, %v3702_v1 }
 0x1b5   :  { %v940_v32 = vpop.f32.mrf.mxu0  ;;  %v2142_v24 = vpop.f32.mrf.mxu1 }
 0x1b6   :  { %v3776_v48 = vadd.f32 %v3696_v55, %v940_v32  ;;  %v1379_v32 = vadd.f32 %v3639_v43, %v3636_v41  ;;  %v1388_v55 = vadd.f32 %v3645_v6, %v3642_v45  ;;  %v2138_v43 = vadd.f32 %v2137_v42, %v2136_v8 }
 0x1b7   :  { %v942_v19 = vpop.f32.mrf.mxu0  ;;  %v2143_v46 = vpop.f32.mrf.mxu1  ;;  %v1329_v4 = vadd.f32 %v1328_v10, %v3705_v14  ;;  %v2132_v42 = vadd.f32 %v3735_v20, %v3730_v35  ;;  %v1374_v10 = vadd.f32 %v1373_v22, %v3746_v40  ;;  %v4546_v22 = vld [vmem:[#allocation21_spill] sm:$0xff] }
 0x1b8   :  { %1322 = vst [vmem:[#allocation2 + $0x1a8] sm:$0xff] %v3776_v48  ;;  %v3785_v13 = vadd.f32 %v3698_v58, %v942_v19  ;;  %v1354_v19 = vadd.f32 %v1353_v51, %v3669_v59  ;;  %v1363_v58 = vadd.f32 %v1362_v63, %v3675_v9  ;;  %v1380_v60 = vadd.f32 %v1379_v32, %v3684_v33 }
 0x1b9   :  { %v1389_v6 = vadd.f32 %v1388_v55, %v3690_v3  ;;  %v1338_v63 = vadd.f32 %v1337_v36, %v3714_v34  ;;  %v2129_v55 = vadd.f32 %v3725_v17, %v3720_v44  ;;  %v4548_v44 = vld [vmem:[#allocation19_spill] sm:$0xff] }
 0x1ba   :  { %v1355_v18 = vadd.f32 %v1354_v19, %v3728_v38  ;;  %v2141_v19 = vadd.f32 %v3762_v7, %v3752_v5  ;;  %v1346_v17 = vadd.f32 %v1345_v53, %v4548_v44 }
 0x1bb   :  { %v2203_v41 = vpop.f32.mrf.mxu0  ;;  %v2209_v31 = vpop.f32.mrf.mxu1 }
 0x1bc   :  { %v1235_v45 = vadd.f32 %v2203_v41, %v2126_v54  ;;  %v1255_v27 = vadd.f32 %v2209_v31, %v2138_v43  ;;  %v2144_v41 = vadd.f32 %v2143_v46, %v2142_v24  ;;  %v4547_v24 = vld [vmem:[#allocation22_spill] sm:$0xff] }
 0x1bd   :  { %v1229_v51 = vpop.f32.mrf.mxu0  ;;  %v1249_v32 = vpop.f32.mrf.mxu1  ;;  %v1364_v46 = vadd.f32 %v1363_v58, %v4547_v24 }
 0x1be   :  { %1282 = vst.msk [vmem:[#allocation2 + $0x68] sm:$0xff] %vm1274_vm0, %v1235_v45  ;;  %v1230_v8 = vadd.f32 %v2123_v47, %v1229_v51  ;;  %v1339_v1 = vsel %vm1274_vm0, %v1235_v45, 0.0  ;;  %1310 = vst.msk [vmem:[#allocation2 + $0x148] sm:$0xff] %vm1274_vm0, %v1255_v27  ;;  %v1250_v15 = vadd.f32 %v2135_v37, %v1249_v32  ;;  %v1375_v43 = vsel %vm1274_vm0, %v1255_v27, 0.0 }
 0x1bf   :  { %v2206_v16 = vpop.f32.mrf.mxu0  ;;  %v1340_v28 = vadd.f32 %v1339_v1, %v1338_v63  ;;  %v2212_v20 = vpop.f32.mrf.mxu1  ;;  %v1376_v36 = vadd.f32 %v1375_v43, %v1374_v10  ;;  %v1356_v45 = vadd.f32 %v1355_v18, %v4546_v22  ;;  %v4549_v18 = vld [vmem:[#allocation17_spill] sm:$0xff]  ;;  %v1365_v32 = vadd.f32 %v1364_v46, %v3741_v61  ;;  %v4551_v1 = vld [vmem:[#allocation20_spill] sm:$0xff] }
 0x1c0   :  { %1275 = vst.msk [vmem:[#allocation2 + $0x30] sm:$0xff] %vm1274_vm0, %v1230_v8  ;;  %v1245_v35 = vadd.f32 %v2206_v16, %v2132_v42  ;;  %v1330_v54 = vsel %vm1274_vm0, %v1230_v8, 0.0  ;;  %1303 = vst.msk [vmem:[#allocation2 + $0x110] sm:$0xff] %vm1274_vm0, %v1250_v15  ;;  %v1265_v27 = vadd.f32 %v2212_v20, %v2144_v41  ;;  %v1381_v63 = vadd.f32 %v1380_v60, %v4549_v18  ;;  %v4550_v42 = vld [vmem:[#allocation18_spill] sm:$0xff] }
 0x1c1   :  { %v1239_v47 = vpop.f32.mrf.mxu0  ;;  %1341 = vadd.xlane.f32.xlu0 %v1340_v28  ;;  %v1259_v37 = vpop.f32.mrf.mxu1  ;;  %1377 = vadd.xlane.f32.xlu1 %v1376_v36  ;;  %v1331_v7 = vadd.f32 %v1330_v54, %v1329_v4  ;;  %v1390_v8 = vadd.f32 %v1389_v6, %v4550_v42  ;;  %v1366_v53 = vsel %vm1274_vm0, %v1250_v15, 0.0  ;;  %v1347_v41 = vadd.f32 %v1346_v17, %v4551_v1 }
 0x1c2   :  { %1296 = vst.msk [vmem:[#allocation2 + $0xd8] sm:$0xff] %vm1274_vm0, %v1245_v35  ;;  %v1240_v31 = vadd.f32 %v2129_v55, %v1239_v47  ;;  %v1357_v51 = vsel %vm1274_vm0, %v1245_v35, 0.0  ;;  %1324 = vst.msk [vmem:[#allocation2 + $0x1b8] sm:$0xff] %vm1274_vm0, %v1265_v27  ;;  %v1260_v58 = vadd.f32 %v2141_v19, %v1259_v37  ;;  %v1382_v10 = vadd.f32 %v1381_v63, %v3750_v50 }
 0x1c3   :  { %v1358_v5 = vadd.f32 %v1357_v51, %v1356_v45  ;;  %v1391_v16 = vadd.f32 %v1390_v8, %v3776_v48  ;;  %v1367_v4 = vadd.f32 %v1366_v53, %v1365_v32  ;;  %v1393_v28 = vsel %vm1274_vm0, %v1265_v27, 0.0 }
 0x1c4   :  { %1289 = vst.msk [vmem:[#allocation2 + $0xa0] sm:$0xff] %vm1274_vm0, %v1240_v31  ;;  %1317 = vst.msk [vmem:[#allocation2 + $0x180] sm:$0xff] %vm1274_vm0, %v1260_v58  ;;  %v1348_v60 = vsel %vm1274_vm0, %v1240_v31, 0.0  ;;  %v1384_v43 = vsel %vm1274_vm0, %v1260_v58, 0.0  ;;  %v1383_v15 = vadd.f32 %v1382_v10, %v3760_v49 }
 0x1c5   :  { %1332 = vadd.xlane.f32.xlu0 %v1331_v7  ;;  %1359 = vadd.xlane.f32.xlu1 %v1358_v5  ;;  %v1349_v6 = vadd.f32 %v1348_v60, %v1347_v41  ;;  %v1392_v55 = vadd.f32 %v1391_v16, %v3785_v13  ;;  %v3841_v46 = vld [vmem:[#allocation2 + $0x68] sm:$0xff]  ;;  %v4553_v16 = vld [vmem:[#allocation14_spill] sm:$0xff] }
 0x1c6   :  { %v1385_v35 = vadd.f32 %v1384_v43, %v1383_v15 }
 0x1c7   :  { %v1394_v20 = vadd.f32 %v1393_v28, %v1392_v55 }
 0x1c9   :  { %1368 = vadd.xlane.f32.xlu0 %v1367_v4  ;;  %1350 = vadd.xlane.f32.xlu1 %v1349_v6  ;;  %v4554_v6 = vld [vmem:[#allocation8_spill] sm:$0xff] }
 0x1cd   :  { %1386 = vadd.xlane.f32.xlu0 %v1385_v35  ;;  %1395 = vadd.xlane.f32.xlu1 %v1394_v20  ;;  %v3871_v35 = vld [vmem:[#allocation2 + $0x30] sm:$0xff] }
 0x24a   :  { %v1342_v36 = vpop.xlane.xlu0 %1341  ;;  %v1378_v54 = vpop.xlane.xlu1 %1377 }
 0x24b   :  { %v3839_v45 = vmul.f32 0.0012755102, %v1342_v36  ;;  %v3849_v17 = vmul.f32 0.0012755102, %v1378_v54 }
 0x24d   :  { %v1476_v19 = vsub.f32 %v3606_v56, %v3839_v45  ;;  %v1477_v47 = vsub.f32 %v3609_v26, %v3839_v45  ;;  %v1478_v27 = vsub.f32 %v3654_v57, %v3839_v45  ;;  %v1479_v37 = vsub.f32 %v3657_v12, %v3839_v45  ;;  %v4552_v12 = vld [vmem:[#allocation3_spill] sm:$0xff] }
 0x24e   :  { %v1333_v31 = vpop.xlane.xlu0 %1332  ;;  %v1482_v51 = vsub.f32 %v3841_v46, %v3839_v45  ;;  %v1360_v63 = vpop.xlane.xlu1 %1359  ;;  %v1480_v56 = vsub.f32 %v3710_v23, %v3839_v45  ;;  %v1481_v57 = vsub.f32 %v3714_v34, %v3839_v45  ;;  %v1504_v43 = vsub.f32 %v4554_v6, %v3849_v17 }
 0x24f   :  { %v3855_v58 = vmul.f32 0.0012755102, %v1333_v31  ;;  %v1532_v5 = vmul.f32 %v1476_v19, %v1476_v19  ;;  %v1533_v26 = vmul.f32 %v1477_v47, %v1477_v47  ;;  %v1534_v7 = vmul.f32 %v1478_v27, %v1478_v27 }
 0x250   :  { %v3865_v10 = vmul.f32 0.0012755102, %v1360_v63  ;;  %v1538_v41 = vmul.f32 %v1482_v51, %v1482_v51  ;;  %v1535_v15 = vmul.f32 %v1479_v37, %v1479_v37  ;;  %v1536_v28 = vmul.f32 %v1480_v56, %v1480_v56 }
 0x251   :  { %v1590_v8 = vadd.f32 %v1533_v26, %v1532_v5  ;;  %v1469_v53 = vsub.f32 %v3600_v52, %v3855_v58  ;;  %v1470_v32 = vsub.f32 %v4552_v12, %v3855_v58  ;;  %v1471_v4 = vsub.f32 %v4553_v16, %v3855_v58  ;;  %v4555_v5 = vld [vmem:[#allocation9_spill] sm:$0xff]  ;;  %v4556_v12 = vld [vmem:[#allocation16_spill] sm:$0xff] }
 0x252   :  { %v1369_v60 = vpop.xlane.xlu0 %1368  ;;  %v1472_v52 = vsub.f32 %v3651_v39, %v3855_v58  ;;  %v1351_v20 = vpop.xlane.xlu1 %1350  ;;  %v1473_v36 = vsub.f32 %v3700_v62, %v3855_v58  ;;  %v1475_v54 = vsub.f32 %v3871_v35, %v3855_v58  ;;  %v1537_v31 = vmul.f32 %v1481_v57, %v1481_v57 }
 0x253   :  { %v1591_v55 = vadd.f32 %v1590_v8, %v1534_v7  ;;  %v1525_v19 = vmul.f32 %v1469_v53, %v1469_v53  ;;  %v1526_v47 = vmul.f32 %v1470_v32, %v1470_v32  ;;  %v3879_v27 = vmul.f32 0.0012755102, %v1369_v60 }
 0x254   :  { %v1474_v51 = vsub.f32 %v3705_v14, %v3855_v58  ;;  %v1595_v63 = vsel %vm1274_vm0, %v1538_v41, 0.0  ;;  %v1527_v56 = vmul.f32 %v1471_v4, %v1471_v4  ;;  %v1505_v26 = vsub.f32 %v4555_v5, %v3849_v17  ;;  %v3892_v4 = vld [vmem:[#allocation2 + $0x148] sm:$0xff] }
 0x255   :  { %v1592_v37 = vadd.f32 %v1591_v55, %v1535_v15  ;;  %v1581_v39 = vadd.f32 %v1526_v47, %v1525_v19  ;;  %v3886_v62 = vmul.f32 0.0012755102, %v1351_v20  ;;  %v1528_v53 = vmul.f32 %v1472_v52, %v1472_v52 }
 0x256   :  { %v1387_v7 = vpop.xlane.xlu0 %1386  ;;  %v1506_v32 = vsub.f32 %v4556_v12, %v3849_v17  ;;  %v1529_v57 = vmul.f32 %v1473_v36, %v1473_v36  ;;  %v1531_v60 = vmul.f32 %v1475_v54, %v1475_v54  ;;  %v1507_v14 = vsub.f32 %v3681_v25, %v3849_v17  ;;  %v1396_v12 = vpop.xlane.xlu1 %1395 }
 0x257   :  { %v1593_v8 = vadd.f32 %v1592_v37, %v1536_v28  ;;  %v1582_v16 = vadd.f32 %v1581_v39, %v1527_v56  ;;  %v1508_v6 = vsub.f32 %v3744_v2, %v3849_v17  ;;  %v1560_v15 = vmul.f32 %v1504_v43, %v1504_v43 }
 0x258   :  { %v1561_v55 = vmul.f32 %v1505_v26, %v1505_v26  ;;  %v3896_v20 = vmul.f32 0.0012755102, %v1387_v7  ;;  %v1530_v28 = vmul.f32 %v1474_v51, %v1474_v51  ;;  %v1510_v36 = vsub.f32 %v3892_v4, %v3849_v17 }
 0x259   :  { %v1594_v41 = vadd.f32 %v1593_v8, %v1537_v31  ;;  %v1583_v52 = vadd.f32 %v1582_v16, %v1528_v53  ;;  %v1509_v19 = vsub.f32 %v3746_v40, %v3849_v17  ;;  %v1562_v25 = vmul.f32 %v1506_v32, %v1506_v32  ;;  %v3909_v8 = vld [vmem:[#allocation2 + $0x110] sm:$0xff] }
 0x25a   :  { %v1626_v47 = vadd.f32 %v1561_v55, %v1560_v15  ;;  %v1497_v37 = vsub.f32 %v3624_v21, %v3879_v27  ;;  %v1498_v43 = vsub.f32 %v3627_v30, %v3879_v27  ;;  %v1499_v51 = vsub.f32 %v3672_v0, %v3879_v27 }
 0x25b   :  { %v1596_v54 = vadd.f32 %v1595_v63, %v1594_v41  ;;  %v1584_v31 = vadd.f32 %v1583_v52, %v1529_v57  ;;  %v1586_v56 = vsel %vm1274_vm0, %v1531_v60, 0.0  ;;  %v1563_v39 = vmul.f32 %v1507_v14, %v1507_v14 }
 0x25c   :  { %v1564_v63 = vmul.f32 %v1508_v6, %v1508_v6  ;;  %v1627_v5 = vadd.f32 %v1626_v47, %v1562_v25  ;;  %v1566_v7 = vmul.f32 %v1510_v36, %v1510_v36  ;;  %v1500_v53 = vsub.f32 %v3675_v9, %v3879_v27  ;;  %v4557_v9 = vld [vmem:[#allocation6_spill] sm:$0xff] }
 0x25d   :  { %1597 = vadd.xlane.f32.xlu1 %v1596_v54  ;;  %v1585_v26 = vadd.f32 %v1584_v31, %v1530_v28  ;;  %v1553_v21 = vmul.f32 %v1497_v37, %v1497_v37  ;;  %v1501_v30 = vsub.f32 %v4547_v24, %v3879_v27  ;;  %v1503_v0 = vsub.f32 %v3909_v8, %v3879_v27  ;;  %v4558_v28 = vld [vmem:[#allocation7_spill] sm:$0xff]  ;;  %v3928_v37 = vld [vmem:[#allocation2 + $0xd8] sm:$0xff] }
 0x25e   :  { %v1628_v32 = vadd.f32 %v1627_v5, %v1563_v39  ;;  %v1554_v57 = vmul.f32 %v1498_v43, %v1498_v43  ;;  %v1565_v16 = vmul.f32 %v1509_v19, %v1509_v19  ;;  %v1502_v14 = vsub.f32 %v3741_v61, %v3879_v27 }
 0x25f   :  { %v1587_v60 = vadd.f32 %v1586_v56, %v1585_v26  ;;  %v1555_v41 = vmul.f32 %v1499_v51, %v1499_v51  ;;  %v1490_v55 = vsub.f32 %v4557_v9, %v3865_v10  ;;  %v1491_v52 = vsub.f32 %v4558_v28, %v3865_v10  ;;  %v3947_v9 = vld [vmem:[#allocation2 + $0xa0] sm:$0xff] }
 0x260   :  { %v1629_v6 = vadd.f32 %v1628_v32, %v1564_v63  ;;  %v1617_v15 = vadd.f32 %v1554_v57, %v1553_v21  ;;  %v3923_v36 = vmul.f32 0.0012755102, %v1396_v12  ;;  %v1631_v24 = vsel %vm1274_vm0, %v1566_v7, 0.0  ;;  %v4559_v21 = vld [vmem:[#allocation4_spill] sm:$0xff]  ;;  %v4560_v32 = vld [vmem:[#allocation5_spill] sm:$0xff] }
 0x261   :  { %1588 = vadd.xlane.f32.xlu0 %v1587_v60  ;;  %v1556_v54 = vmul.f32 %v1500_v53, %v1500_v53  ;;  %v1492_v19 = vsub.f32 %v3666_v11, %v3865_v10  ;;  %v1557_v61 = vmul.f32 %v1501_v30, %v1501_v30  ;;  %v1559_v47 = vmul.f32 %v1503_v0, %v1503_v0 }
 0x262   :  { %v1630_v25 = vadd.f32 %v1629_v6, %v1565_v16  ;;  %v1618_v31 = vadd.f32 %v1617_v15, %v1555_v41  ;;  %v1493_v43 = vsub.f32 %v3669_v59, %v3865_v10  ;;  %v1496_v51 = vsub.f32 %v3928_v37, %v3865_v10  ;;  %v4561_v41 = vld [vmem:[#allocation15_spill] sm:$0xff] }
 0x263   :  { %v1546_v56 = vmul.f32 %v1490_v55, %v1490_v55  ;;  %v1547_v39 = vmul.f32 %v1491_v52, %v1491_v52  ;;  %v1558_v5 = vmul.f32 %v1502_v14, %v1502_v14  ;;  %v1494_v11 = vsub.f32 %v3728_v38, %v3865_v10 }
 0x264   :  { %v1632_v63 = vadd.f32 %v1631_v24, %v1630_v25  ;;  %v1619_v26 = vadd.f32 %v1618_v31, %v1556_v54  ;;  %v1548_v7 = vmul.f32 %v1492_v19, %v1492_v19  ;;  %v1483_v12 = vsub.f32 %v4559_v21, %v3886_v62 }
 0x265   :  { %v1608_v53 = vadd.f32 %v1547_v39, %v1546_v56  ;;  %v1484_v30 = vsub.f32 %v4560_v32, %v3886_v62  ;;  %v1622_v0 = vsel %vm1274_vm0, %v1559_v47, 0.0  ;;  %v1495_v57 = vsub.f32 %v4546_v22, %v3865_v10  ;;  %v4562_v47 = vld [vmem:[#allocation12_spill] sm:$0xff] }
 0x266   :  { %1633 = vadd.xlane.f32.xlu1 %v1632_v63  ;;  %v1620_v59 = vadd.f32 %v1619_v26, %v1557_v61  ;;  %v1485_v60 = vsub.f32 %v3660_v29, %v3886_v62  ;;  %v1549_v16 = vmul.f32 %v1493_v43, %v1493_v43  ;;  %v1552_v38 = vmul.f32 %v1496_v51, %v1496_v51 }
 0x267   :  { %v1609_v14 = vadd.f32 %v1608_v53, %v1548_v7  ;;  %v1486_v6 = vsub.f32 %v4561_v41, %v3886_v62  ;;  %v1487_v55 = vsub.f32 %v4548_v44, %v3886_v62  ;;  %v1539_v28 = vmul.f32 %v1483_v12, %v1483_v12  ;;  %v4563_v44 = vld [vmem:[#allocation13_spill] sm:$0xff] }
 0x268   :  { %v1621_v15 = vadd.f32 %v1620_v59, %v1558_v5  ;;  %v1540_v52 = vmul.f32 %v1484_v30, %v1484_v30  ;;  %v1550_v24 = vmul.f32 %v1494_v11, %v1494_v11  ;;  %v1488_v22 = vsub.f32 %v4551_v1, %v3886_v62 }
 0x269   :  { %v1610_v54 = vadd.f32 %v1609_v14, %v1549_v16  ;;  %v1489_v29 = vsub.f32 %v3947_v9, %v3886_v62  ;;  %v1541_v25 = vmul.f32 %v1485_v60, %v1485_v60  ;;  %v1518_v31 = vsub.f32 %v4562_v47, %v3923_v36  ;;  %v4564_v14 = vld [vmem:[#allocation10_spill] sm:$0xff] }
 0x26a   :  { %v1623_v19 = vadd.f32 %v1622_v0, %v1621_v15  ;;  %v1599_v61 = vadd.f32 %v1540_v52, %v1539_v28  ;;  %v1551_v43 = vmul.f32 %v1495_v57, %v1495_v57  ;;  %v1519_v56 = vsub.f32 %v4563_v44, %v3923_v36 }
 0x26b   :  { %v1611_v51 = vadd.f32 %v1610_v54, %v1550_v24  ;;  %v1520_v39 = vsub.f32 %v3690_v3, %v3923_v36  ;;  %v1613_v1 = vsel %vm1274_vm0, %v1552_v38, 0.0  ;;  %v1542_v63 = vmul.f32 %v1486_v6, %v1486_v6  ;;  %v3966_v3 = vld [vmem:[#allocation2 + $0x1b8] sm:$0xff]  ;;  %v4565_v6 = vld [vmem:[#allocation11_spill] sm:$0xff] }
 0x26c   :  { %1624 = vadd.xlane.f32.xlu0 %v1623_v19  ;;  %v1543_v5 = vmul.f32 %v1487_v55, %v1487_v55  ;;  %v1600_v26 = vadd.f32 %v1599_v61, %v1541_v25  ;;  %v1521_v7 = vsub.f32 %v4550_v42, %v3923_v36  ;;  %v1574_v53 = vmul.f32 %v1518_v31, %v1518_v31 }
 0x26d   :  { %v1612_v11 = vadd.f32 %v1611_v51, %v1551_v43  ;;  %v1575_v21 = vmul.f32 %v1519_v56, %v1519_v56  ;;  %v1544_v12 = vmul.f32 %v1488_v22, %v1488_v22  ;;  %v1545_v32 = vmul.f32 %v1489_v29, %v1489_v29  ;;  %v3981_v51 = vld [vmem:[#allocation2 + $0x180] sm:$0xff] }
 0x26e   :  { %v1601_v30 = vadd.f32 %v1600_v26, %v1542_v63  ;;  %v1522_v59 = vsub.f32 %v3776_v48, %v3923_v36  ;;  %v1523_v57 = vsub.f32 %v3785_v13, %v3923_v36  ;;  %v1576_v60 = vmul.f32 %v1520_v39, %v1520_v39 }
 0x26f   :  { %v1614_v0 = vadd.f32 %v1613_v1, %v1612_v11  ;;  %v1644_v16 = vadd.f32 %v1575_v21, %v1574_v53  ;;  %v1524_v42 = vsub.f32 %v3966_v3, %v3923_v36  ;;  %v1511_v41 = vsub.f32 %v4564_v14, %v3896_v20 }
 0x270   :  { %v1602_v38 = vadd.f32 %v1601_v30, %v1543_v5  ;;  %v1512_v15 = vsub.f32 %v4565_v6, %v3896_v20  ;;  %v1577_v48 = vmul.f32 %v1521_v7, %v1521_v7  ;;  %v1513_v28 = vsub.f32 %v3684_v33, %v3896_v20 }
 0x271   :  { %1615 = vadd.xlane.f32.xlu1 %v1614_v0  ;;  %v1645_v55 = vadd.f32 %v1644_v16, %v1576_v60  ;;  %v1604_v24 = vsel %vm1274_vm0, %v1545_v32, 0.0  ;;  %v1567_v54 = vmul.f32 %v1511_v41, %v1511_v41  ;;  %v1578_v22 = vmul.f32 %v1522_v59, %v1522_v59 }
 0x272   :  { %v1603_v52 = vadd.f32 %v1602_v38, %v1544_v12  ;;  %v1514_v19 = vsub.f32 %v4549_v18, %v3896_v20  ;;  %v1568_v25 = vmul.f32 %v1512_v15, %v1512_v15  ;;  %v1579_v47 = vmul.f32 %v1523_v57, %v1523_v57 }
 0x273   :  { %v1646_v29 = vadd.f32 %v1645_v55, %v1577_v48  ;;  %v1580_v31 = vmul.f32 %v1524_v42, %v1524_v42  ;;  %v1515_v44 = vsub.f32 %v3750_v50, %v3896_v20  ;;  %v1569_v33 = vmul.f32 %v1513_v28, %v1513_v28  ;;  %v1670_v48 = vld [vmem:[%s4496_s3 + $0x8] sm:$0xff] }
 0x274   :  { %v1605_v61 = vadd.f32 %v1604_v24, %v1603_v52  ;;  %v1635_v56 = vadd.f32 %v1568_v25, %v1567_v54  ;;  %v1517_v39 = vsub.f32 %v3981_v51, %v3896_v20  ;;  %v1516_v18 = vsub.f32 %v3760_v49, %v3896_v20 }
 0x275   :  { %v1647_v43 = vadd.f32 %v1646_v29, %v1578_v22  ;;  %v1570_v63 = vmul.f32 %v1514_v19, %v1514_v19  ;;  %v1649_v26 = vsel %vm1274_vm0, %v1580_v31, 0.0  ;;  %v1571_v7 = vmul.f32 %v1515_v44, %v1515_v44  ;;  %v1669_v22 = vld [vmem:[%s4496_s3] sm:$0xff]  ;;  %v1702_v31 = vld [vmem:[%s4497_s4 + $0x8] sm:$0xff] }
 0x276   :  { %1606 = vadd.xlane.f32.xlu0 %v1605_v61  ;;  %v1636_v5 = vadd.f32 %v1635_v56, %v1569_v33  ;;  %v1573_v21 = vmul.f32 %v1517_v39, %v1517_v39  ;;  %v1572_v50 = vmul.f32 %v1516_v18, %v1516_v18  ;;  %v2313_v0 = vmov 0  }
 0x277   :  { %v1648_v1 = vadd.f32 %v1647_v43, %v1579_v47  ;;  %2247 = vset.pattern.permute.xlu1 %v2313_v0  ;;  %2248 = vset.pattern.permute.xlu0 %v2313_v0  ;;  %v1674_v43 = vld [vmem:[%s4496_s3 + $0x28] sm:$0xff] }
 0x278   :  { %v1637_v53 = vadd.f32 %v1636_v5, %v1570_v63  ;;  %v1640_v30 = vsel %vm1274_vm0, %v1573_v21, 0.0 }
 0x279   :  { %v1650_v11 = vadd.f32 %v1649_v26, %v1648_v1  ;;  %v1673_v26 = vld [vmem:[%s4496_s3 + $0x20] sm:$0xff] }
 0x27a   :  { %v1638_v12 = vadd.f32 %v1637_v53, %v1571_v7 }
 0x27b   :  { %1651 = vadd.xlane.f32.xlu1 %v1650_v11 }
 0x27c   :  { %v1639_v32 = vadd.f32 %v1638_v12, %v1572_v50 }
 0x27e   :  { %v1641_v59 = vadd.f32 %v1640_v30, %v1639_v32  ;;  %v1672_v32 = vld [vmem:[%s4496_s3 + $0x18] sm:$0xff] }
 0x280   :  { %1642 = vadd.xlane.f32.xlu0 %v1641_v59 }
 0x2e6   :  { %v1598_v49 = vpop.xlane.xlu1 %1597 }
 0x2e7   :  { %v1662_v57 = vmul.f32 0.0012755102, %v1598_v49  ;;  %v1704_v49 = vld [vmem:[%s4497_s4 + $0x18] sm:$0xff] }
 0x2e9   :  { %v1678_v60 = vadd.f32 1e-05, %v1662_v57 }
 0x2ea   :  { %v1589_v16 = vpop.xlane.xlu0 %1588 }
 0x2eb   :  { %2249 = vrsqrt.f32 %v1678_v60  ;;  %v1661_v38 = vmul.f32 0.0012755102, %v1589_v16  ;;  %v1676_v16 = vld [vmem:[%s4496_s3 + $0x38] sm:$0xff] }
 0x2ed   :  { %v1677_v42 = vadd.f32 1e-05, %v1661_v38 }
 0x2ef   :  { %2251 = vrsqrt.f32 %v1677_v42  ;;  %v1634_v14 = vpop.xlane.xlu1 %1633 }
 0x2f0   :  { %v1666_v41 = vmul.f32 0.0012755102, %v1634_v14 }
 0x2f2   :  { %v1682_v6 = vadd.f32 1e-05, %v1666_v41  ;;  %v1671_v41 = vld [vmem:[%s4496_s3 + $0x10] sm:$0xff] }
 0x2f4   :  { %2253 = vrsqrt.f32 %v1682_v6  ;;  %v1708_v6 = vld [vmem:[%s4497_s4 + $0x38] sm:$0xff] }
 0x2f5   :  { %v1625_v15 = vpop.xlane.xlu0 %1624 }
 0x2f6   :  { %v1665_v55 = vmul.f32 0.0012755102, %v1625_v15 }
 0x2f8   :  { %v2250_v28 = vpop.eup %2249  ;;  %v1681_v52 = vadd.f32 1e-05, %v1665_v55 }
 0x2f9   :  { %v1694_v24 = vmul.f32 %v2250_v28, %v1670_v48  ;;  %v1675_v28 = vld [vmem:[%s4496_s3 + $0x30] sm:$0xff] }
 0x2fa   :  { %2255 = vrsqrt.f32 %v1681_v52  ;;  %v1616_v54 = vpop.xlane.xlu1 %1615 }
 0x2fb   :  { %1732 = vperm.xlu1 %2247, %v1694_v24   ;;  %v1664_v29 = vmul.f32 0.0012755102, %v1616_v54  ;;  %v1710_v47 = vmul.f32 %v1694_v24, %v3839_v45  ;;  %v1706_v45 = vld [vmem:[%s4497_s4 + $0x28] sm:$0xff]  ;;  %v1701_v54 = vld [vmem:[%s4497_s4] sm:$0xff] }
 0x2fc   :  { %v2252_v19 = vpop.eup %2251 }
 0x2fd   :  { %v1680_v25 = vadd.f32 1e-05, %v1664_v29  ;;  %v1693_v61 = vmul.f32 %v2252_v19, %v1669_v22  ;;  %v1718_v56 = vsub.f32 %v1702_v31, %v1710_v47  ;;  %v1705_v29 = vld [vmem:[%s4497_s4 + $0x20] sm:$0xff] }
 0x2ff   :  { %2257 = vrsqrt.f32 %v1680_v25  ;;  %1727 = vperm.xlu0 %2248, %v1693_v61   ;;  %v1607_v44 = vpop.xlane.xlu0 %1606  ;;  %v1709_v24 = vmul.f32 %v1693_v61, %v3855_v58  ;;  %v1703_v58 = vld [vmem:[%s4497_s4 + $0x10] sm:$0xff] }
 0x300   :  { %v1663_v1 = vmul.f32 0.0012755102, %v1607_v44 }
 0x301   :  { %v2254_v33 = vpop.eup %2253  ;;  %v1717_v22 = vsub.f32 %v1701_v54, %v1709_v24 }
 0x302   :  { %v1698_v39 = vmul.f32 %v2254_v33, %v1674_v43  ;;  %v1679_v53 = vadd.f32 1e-05, %v1663_v1  ;;  %v2269_v33 = vld [vmem:[#allocation2 + $0x38] sm:$0xff]  ;;  %v2271_v1 = vld [vmem:[#allocation2 + $0x48] sm:$0xff] }
 0x303   :  { %1828 = vperm.xlu0 %2248, %v1718_v56   ;;  %v2270_v56 = vld [vmem:[#allocation2 + $0x40] sm:$0xff] }
 0x304   :  { %v1652_v18 = vpop.xlane.xlu1 %1651  ;;  %1752 = vperm.xlu1 %2247, %v1698_v39   ;;  %v1714_v63 = vmul.f32 %v1698_v39, %v3849_v17 }
 0x305   :  { %v1668_v5 = vmul.f32 0.0012755102, %v1652_v18  ;;  %v2272_v18 = vld [vmem:[#allocation2 + $0x50] sm:$0xff] }
 0x306   :  { %v1722_v11 = vsub.f32 %v1706_v45, %v1714_v63 }
 0x307   :  { %v2256_v7 = vpop.eup %2255  ;;  %v1684_v21 = vadd.f32 1e-05, %v1668_v5 }
 0x308   :  { %v1697_v50 = vmul.f32 %v2256_v7, %v1673_v26  ;;  %1848 = vperm.xlu0 %2248, %v1722_v11   ;;  %v1924_v7 = vld [vmem:[%s4498_s2 + $0x38] sm:$0xff] }
 0x309   :  { %2259 = vrsqrt.f32 %v1684_v21  ;;  %v1643_v12 = vpop.xlane.xlu0 %1642 }
 0x30a   :  { %1747 = vperm.xlu1 %2247, %v1697_v50   ;;  %2261 = vrsqrt.f32 %v1679_v53  ;;  %v1667_v17 = vmul.f32 0.0012755102, %v1643_v12  ;;  %v1925_v53 = vld [vmem:[%s4498_s2 + $0x40] sm:$0xff] }
 0x30c   :  { %v2258_v30 = vpop.eup %2257  ;;  %v1683_v59 = vadd.f32 1e-05, %v1667_v17 }
 0x30d   :  { %v1696_v0 = vmul.f32 %v2258_v30, %v1672_v32  ;;  %v2273_v30 = vld [vmem:[#allocation2 + $0x118] sm:$0xff] }
 0x30e   :  { %2263 = vrsqrt.f32 %v1683_v59  ;;  %v2274_v59 = vld [vmem:[#allocation2 + $0x120] sm:$0xff] }
 0x30f   :  { %1742 = vperm.xlu1 %2247, %v1696_v0   ;;  %v1712_v57 = vmul.f32 %v1696_v0, %v3865_v10  ;;  %v2275_v0 = vld [vmem:[#allocation2 + $0x128] sm:$0xff] }
 0x311   :  { %v1720_v60 = vsub.f32 %v1704_v49, %v1712_v57  ;;  %v1926_v57 = vld [vmem:[%s4498_s2 + $0x48] sm:$0xff] }
 0x313   :  { %1838 = vperm.xlu0 %2248, %v1720_v60   ;;  %v1927_v60 = vld [vmem:[%s4498_s2 + $0x50] sm:$0xff] }
 0x316   :  { %v2260_v38 = vpop.eup %2259 }
 0x317   :  { %v1700_v42 = vmul.f32 %v2260_v38, %v1676_v16  ;;  %v2262_v14 = vpop.eup %2261  ;;  %v1928_v16 = vld [vmem:[%s4498_s2 + $0x58] sm:$0xff]  ;;  %v2276_v38 = vld [vmem:[#allocation2 + $0x130] sm:$0xff] }
 0x318   :  { %v1695_v15 = vmul.f32 %v2262_v14, %v1671_v41  ;;  %v1929_v41 = vld [vmem:[%s4498_s2 + $0x60] sm:$0xff] }
 0x319   :  { %1762 = vperm.xlu1 %2247, %v1700_v42   ;;  %v1716_v10 = vmul.f32 %v1700_v42, %v3923_v36  ;;  %v1713_v36 = vmul.f32 %v1697_v50, %v3879_v27  ;;  %v1707_v27 = vld [vmem:[%s4497_s4 + $0x30] sm:$0xff] }
 0x31a   :  { %v1711_v25 = vmul.f32 %v1695_v15, %v3886_v62 }
 0x31b   :  { %v1724_v48 = vsub.f32 %v1708_v6, %v1716_v10  ;;  %v2264_v55 = vpop.eup %2263  ;;  %v1721_v19 = vsub.f32 %v1705_v29, %v1713_v36  ;;  %v1930_v6 = vld [vmem:[%s4498_s2 + $0x68] sm:$0xff]  ;;  %v1952_v29 = vld [vmem:[%s4498_s2 + $0x118] sm:$0xff] }
 0x31c   :  { %v1699_v52 = vmul.f32 %v2264_v55, %v1675_v28  ;;  %v1719_v61 = vsub.f32 %v1703_v58, %v1711_v25  ;;  %v1953_v58 = vld [vmem:[%s4498_s2 + $0x120] sm:$0xff] }
 0x31d   :  { %1737 = vperm.xlu1 %2247, %v1695_v15   ;;  %1858 = vperm.xlu0 %2248, %v1724_v48  }
 0x31e   :  { %v1715_v47 = vmul.f32 %v1699_v52, %v3896_v20 }
 0x320   :  { %v1723_v31 = vsub.f32 %v1707_v27, %v1715_v47  ;;  %v1955_v47 = vld [vmem:[%s4498_s2 + $0x130] sm:$0xff] }
 0x321   :  { %1757 = vperm.xlu1 %2247, %v1699_v52  }
 0x325   :  { %1823 = vperm.xlu1 %2247, %v1717_v22  }
 0x329   :  { %1843 = vperm.xlu1 %2247, %v1721_v19  }
 0x32d   :  { %1833 = vperm.xlu1 %2247, %v1719_v61   ;;  %v1954_v61 = vld [vmem:[%s4498_s2 + $0x128] sm:$0xff] }
 0x331   :  { %1853 = vperm.xlu1 %2247, %v1723_v31  }
 0x376   :  { %v1733_v43 = vpop.permute.xlu1 %1732 }
 0x377   :  { %v1772_v62 = vmul.f32 %v2269_v33, %v1733_v43  ;;  %v1773_v39 = vmul.f32 %v2270_v56, %v1733_v43  ;;  %v1774_v45 = vmul.f32 %v2271_v1, %v1733_v43  ;;  %v1775_v63 = vmul.f32 %v2272_v18, %v1733_v43  ;;  %v1957_v56 = vld [vmem:[%s4498_s2 + $0x140] sm:$0xff] }
 0x378   :  { %v1776_v20 = vmul.f32 %v1733_v43, %v3710_v23  ;;  %v1777_v5 = vmul.f32 %v1733_v43, %v3714_v34  ;;  %v1778_v17 = vmul.f32 %v1733_v43, %v3841_v46 }
 0x37a   :  { %v4047_v44 = vpop.permute.xlu0 %1727 }
 0x37e   :  { %v1829_v26 = vpop.permute.xlu0 %1828 }
 0x37f   :  { %v1753_v11 = vpop.permute.xlu1 %1752  ;;  %v1868_v21 = vadd.f32 %v1829_v26, %v1772_v62  ;;  %v1869_v50 = vadd.f32 %v1829_v26, %v1773_v39  ;;  %v1870_v12 = vadd.f32 %v1829_v26, %v1774_v45  ;;  %v1871_v32 = vadd.f32 %v1829_v26, %v1775_v63  ;;  %v1956_v62 = vld [vmem:[%s4498_s2 + $0x138] sm:$0xff]  ;;  %v1958_v39 = vld [vmem:[%s4498_s2 + $0x148] sm:$0xff] }
 0x380   :  { %v1800_v23 = vmul.f32 %v2273_v30, %v1753_v11  ;;  %v1801_v34 = vmul.f32 %v2274_v59, %v1753_v11  ;;  %v1802_v49 = vmul.f32 %v2275_v0, %v1753_v11  ;;  %v1803_v46 = vmul.f32 %v2276_v38, %v1753_v11  ;;  %v2280_v30 = vld [vmem:[#allocation2 + $0xc0] sm:$0xff]  ;;  %v1938_v59 = vld [vmem:[%s4498_s2 + $0xa8] sm:$0xff]  ;;  %v1940_v38 = vld [vmem:[%s4498_s2 + $0xb8] sm:$0xff] }
 0x381   :  { %v1804_v42 = vmul.f32 %v1753_v11, %v3744_v2  ;;  %v1805_v14 = vmul.f32 %v1753_v11, %v3746_v40  ;;  %v1872_v10 = vadd.f32 %v1829_v26, %v1776_v20  ;;  %v1873_v15 = vadd.f32 %v1829_v26, %v1777_v5 }
 0x382   :  { %v1874_v48 = vadd.f32 %v1829_v26, %v1778_v17  ;;  %v1980_v55 = vadd.f32 %v1924_v7, %v1868_v21  ;;  %v1981_v28 = vadd.f32 %v1925_v53, %v1869_v50  ;;  %v1806_v52 = vmul.f32 %v1753_v11, %v3892_v4  ;;  %v2277_v53 = vld [vmem:[#allocation2 + $0xa8] sm:$0xff]  ;;  %v2278_v50 = vld [vmem:[#allocation2 + $0xb0] sm:$0xff] }
 0x383   :  { %v1982_v24 = vadd.f32 %v1926_v57, %v1870_v12  ;;  %v1983_v54 = vadd.f32 %v1927_v60, %v1871_v32  ;;  %v1984_v2 = vadd.f32 %v1928_v16, %v1872_v10  ;;  %v1849_v22 = vpop.permute.xlu0 %1848  ;;  %v1985_v40 = vadd.f32 %v1929_v41, %v1873_v15  ;;  %v2279_v32 = vld [vmem:[#allocation2 + $0xb8] sm:$0xff]  ;;  %v1939_v16 = vld [vmem:[%s4498_s2 + $0xb0] sm:$0xff] }
 0x384   :  { %v1986_v36 = vadd.f32 %v1930_v6, %v1874_v48  ;;  %2036 = vst [vmem:[%s4499_s5 + $0x38] sm:$0xff] %v1980_v55  ;;  %2037 = vst [vmem:[%s4499_s5 + $0x40] sm:$0xff] %v1981_v28  ;;  %v1896_v19 = vadd.f32 %v1849_v22, %v1800_v23  ;;  %v1897_v4 = vadd.f32 %v1849_v22, %v1801_v34  ;;  %v2281_v34 = vld [vmem:[#allocation2 + $0xc8] sm:$0xff]  ;;  %v1944_v41 = vld [vmem:[%s4498_s2 + $0xd8] sm:$0xff] }
 0x385   :  { %2038 = vst [vmem:[%s4499_s5 + $0x48] sm:$0xff] %v1982_v24  ;;  %2039 = vst [vmem:[%s4499_s5 + $0x50] sm:$0xff] %v1983_v54  ;;  %v4094_v25 = vpop.permute.xlu1 %1747  ;;  %v1898_v27 = vadd.f32 %v1849_v22, %v1802_v49  ;;  %v1899_v31 = vadd.f32 %v1849_v22, %v1803_v46  ;;  %v1900_v43 = vadd.f32 %v1849_v22, %v1804_v42  ;;  %v2282_v49 = vld [vmem:[#allocation2 + $0xd0] sm:$0xff]  ;;  %v1941_v46 = vld [vmem:[%s4498_s2 + $0xc0] sm:$0xff] }
 0x386   :  { %2040 = vst [vmem:[%s4499_s5 + $0x58] sm:$0xff] %v1984_v2  ;;  %v1901_v33 = vadd.f32 %v1849_v22, %v1805_v14  ;;  %2041 = vst [vmem:[%s4499_s5 + $0x60] sm:$0xff] %v1985_v40  ;;  %v1902_v1 = vadd.f32 %v1849_v22, %v1806_v52  ;;  %v2008_v45 = vadd.f32 %v1952_v29, %v1896_v19  ;;  %v1942_v14 = vld [vmem:[%s4498_s2 + $0xc8] sm:$0xff] }
 0x387   :  { %2042 = vst.msk [vmem:[%s4499_s5 + $0x68] sm:$0xff] %vm1274_vm0, %v1986_v36  ;;  %v2009_v18 = vadd.f32 %v1953_v58, %v1897_v4  ;;  %v2010_v63 = vadd.f32 %v1954_v61, %v1898_v27  ;;  %v2011_v20 = vadd.f32 %v1955_v47, %v1899_v31  ;;  %v2012_v5 = vadd.f32 %v1956_v62, %v1900_v43  ;;  %v2283_v4 = vld [vmem:[#allocation2] sm:$0xff]  ;;  %v2284_v61 = vld [vmem:[#allocation2 + $0x8] sm:$0xff]  ;;  %v2285_v27 = vld [vmem:[#allocation2 + $0x10] sm:$0xff] }
 0x388   :  { %v2013_v26 = vadd.f32 %v1957_v56, %v1901_v33  ;;  %v2014_v11 = vadd.f32 %v1958_v39, %v1902_v1  ;;  %2064 = vst [vmem:[%s4499_s5 + $0x118] sm:$0xff] %v2008_v45  ;;  %v4188_v58 = vmul.f32 %v2283_v4, %v4047_v44  ;;  %v4191_v47 = vmul.f32 %v2284_v61, %v4047_v44  ;;  %v1966_v43 = vld [vmem:[%s4498_s2 + $0x188] sm:$0xff]  ;;  %v2287_v56 = vld [vmem:[#allocation2 + $0x190] sm:$0xff]  ;;  %v2288_v1 = vld [vmem:[#allocation2 + $0x198] sm:$0xff] }
 0x389   :  { %2065 = vst [vmem:[%s4499_s5 + $0x120] sm:$0xff] %v2009_v18  ;;  %2066 = vst [vmem:[%s4499_s5 + $0x128] sm:$0xff] %v2010_v63  ;;  %v4194_v31 = vmul.f32 %v2285_v27, %v4047_v44  ;;  %v2286_v33 = vld [vmem:[#allocation2 + $0x188] sm:$0xff]  ;;  %v2289_v18 = vld [vmem:[#allocation2 + $0x1a0] sm:$0xff]  ;;  %v4260_v61 = vmul.f32 %v4094_v25, %v3909_v8 }
 0x38a   :  { %2067 = vst [vmem:[%s4499_s5 + $0x130] sm:$0xff] %v2011_v20  ;;  %v1743_v7 = vpop.permute.xlu1 %1742  ;;  %2068 = vst [vmem:[%s4499_s5 + $0x138] sm:$0xff] %v2012_v5  ;;  %v2290_v20 = vld [vmem:[#allocation2 + $0x18] sm:$0xff]  ;;  %v2300_v27 = vld [vmem:[#allocation2 + $0x70] sm:$0xff] }
 0x38b   :  { %2069 = vst [vmem:[%s4499_s5 + $0x140] sm:$0xff] %v2013_v26  ;;  %2070 = vst.msk [vmem:[%s4499_s5 + $0x148] sm:$0xff] %vm1274_vm0, %v2014_v11  ;;  %v1786_v21 = vmul.f32 %v2277_v53, %v1743_v7  ;;  %v1787_v12 = vmul.f32 %v2278_v50, %v1743_v7  ;;  %v1788_v17 = vmul.f32 %v2279_v32, %v1743_v7  ;;  %v1967_v26 = vld [vmem:[%s4498_s2 + $0x190] sm:$0xff]  ;;  %v1968_v11 = vld [vmem:[%s4498_s2 + $0x198] sm:$0xff] }
 0x38c   :  { %v1789_v23 = vmul.f32 %v2280_v30, %v1743_v7  ;;  %v1790_v0 = vmul.f32 %v2281_v34, %v1743_v7  ;;  %v1791_v57 = vmul.f32 %v2282_v49, %v1743_v7  ;;  %v1792_v60 = vmul.f32 %v1743_v7, %v3928_v37  ;;  %v1943_v37 = vld [vmem:[%s4498_s2 + $0xd0] sm:$0xff]  ;;  %v1969_v7 = vld [vmem:[%s4498_s2 + $0x1a0] sm:$0xff]  ;;  %v1970_v30 = vld [vmem:[%s4498_s2 + $0x1a8] sm:$0xff] }
 0x38d   :  { %v4200_v5 = vmul.f32 %v2290_v20, %v4047_v44  ;;  %v2302_v8 = vld [vmem:[#allocation2 + $0x80] sm:$0xff] }
 0x38e   :  { %v1839_v42 = vpop.permute.xlu0 %1838 }
 0x38f   :  { %v1882_v6 = vadd.f32 %v1839_v42, %v1786_v21  ;;  %v1883_v10 = vadd.f32 %v1839_v42, %v1787_v12  ;;  %v1884_v15 = vadd.f32 %v1839_v42, %v1788_v17  ;;  %v1885_v48 = vadd.f32 %v1839_v42, %v1789_v23  ;;  %v2291_v21 = vld [vmem:[#allocation2 + $0x1a8] sm:$0xff]  ;;  %v1971_v23 = vld [vmem:[%s4498_s2 + $0x1b0] sm:$0xff] }
 0x390   :  { %v1886_v55 = vadd.f32 %v1839_v42, %v1790_v0  ;;  %v1887_v28 = vadd.f32 %v1839_v42, %v1791_v57  ;;  %v1888_v52 = vadd.f32 %v1839_v42, %v1792_v60 }
 0x391   :  { %v1994_v24 = vadd.f32 %v1938_v59, %v1882_v6  ;;  %v1995_v54 = vadd.f32 %v1939_v16, %v1883_v10  ;;  %v1996_v2 = vadd.f32 %v1940_v38, %v1884_v15  ;;  %v1997_v22 = vadd.f32 %v1941_v46, %v1885_v48  ;;  %v1972_v59 = vld [vmem:[%s4498_s2 + $0x1b8] sm:$0xff] }
 0x392   :  { %v1998_v40 = vadd.f32 %v1942_v14, %v1886_v55  ;;  %v1999_v36 = vadd.f32 %v1943_v37, %v1887_v28  ;;  %v2000_v29 = vadd.f32 %v1944_v41, %v1888_v52  ;;  %v2293_v41 = vld [vmem:[#allocation2 + $0x28] sm:$0xff]  ;;  %v1771_v28 = vmul.f32 %v4047_v44, %v3871_v35  ;;  %v2294_v52 = vld [vmem:[#allocation2 + $0xe0] sm:$0xff]  ;;  %v2297_v35 = vld [vmem:[#allocation2 + $0xf8] sm:$0xff] }
 0x393   :  { %2050 = vst [vmem:[%s4499_s5 + $0xa8] sm:$0xff] %v1994_v24  ;;  %2051 = vst [vmem:[%s4499_s5 + $0xb0] sm:$0xff] %v1995_v54  ;;  %v1770_v6 = vmul.f32 %v2293_v41, %v4047_v44  ;;  %v4229_v24 = vmul.f32 %v2294_v52, %v4094_v25  ;;  %v2295_v54 = vld [vmem:[#allocation2 + $0xe8] sm:$0xff] }
 0x394   :  { %2052 = vst [vmem:[%s4499_s5 + $0xb8] sm:$0xff] %v1996_v2  ;;  %2053 = vst [vmem:[%s4499_s5 + $0xc0] sm:$0xff] %v1997_v22  ;;  %v1763_v19 = vpop.permute.xlu1 %1762  ;;  %v4232_v2 = vmul.f32 %v2295_v54, %v4094_v25  ;;  %v2296_v22 = vld [vmem:[#allocation2 + $0xf0] sm:$0xff] }
 0x395   :  { %2054 = vst [vmem:[%s4499_s5 + $0xc8] sm:$0xff] %v1998_v40  ;;  %2055 = vst [vmem:[%s4499_s5 + $0xd0] sm:$0xff] %v1999_v36  ;;  %v1814_v62 = vmul.f32 %v2286_v33, %v1763_v19  ;;  %v1815_v39 = vmul.f32 %v2287_v56, %v1763_v19  ;;  %v1816_v45 = vmul.f32 %v2288_v1, %v1763_v19  ;;  %v2298_v36 = vld [vmem:[#allocation2 + $0x100] sm:$0xff]  ;;  %v2301_v33 = vld [vmem:[#allocation2 + $0x78] sm:$0xff] }
 0x396   :  { %2056 = vst.msk [vmem:[%s4499_s5 + $0xd8] sm:$0xff] %vm1274_vm0, %v2000_v29  ;;  %v1817_v63 = vmul.f32 %v2289_v18, %v1763_v19  ;;  %v1818_v50 = vmul.f32 %v2291_v21, %v1763_v19  ;;  %v1819_v12 = vmul.f32 %v1763_v19, %v3785_v13  ;;  %v1820_v32 = vmul.f32 %v1763_v19, %v3966_v3  ;;  %v2292_v13 = vld [vmem:[#allocation2 + $0x20] sm:$0xff]  ;;  %v2299_v19 = vld [vmem:[#allocation2 + $0x108] sm:$0xff] }
 0x397   :  { %v1769_v3 = vmul.f32 %v2292_v13, %v4047_v44  ;;  %v4235_v40 = vmul.f32 %v2296_v22, %v4094_v25  ;;  %v4250_v44 = vmul.f32 %v2297_v35, %v4094_v25  ;;  %v4253_v29 = vmul.f32 %v2298_v36, %v4094_v25  ;;  %v2303_v56 = vld [vmem:[#allocation2 + $0x88] sm:$0xff]  ;;  %v1917_v1 = vld [vmem:[%s4498_s2] sm:$0xff]  ;;  %v2307_v13 = vld [vmem:[#allocation2 + $0x158] sm:$0xff] }
 0x398   :  { %v1859_v53 = vpop.permute.xlu0 %1858  ;;  %v1738_v17 = vpop.permute.xlu1 %1737  ;;  %v4256_v4 = vmul.f32 %v2299_v19, %v4094_v25 }
 0x399   :  { %v1910_v34 = vadd.f32 %v1859_v53, %v1814_v62  ;;  %v1911_v0 = vadd.f32 %v1859_v53, %v1815_v39  ;;  %v1912_v49 = vadd.f32 %v1859_v53, %v1816_v45  ;;  %v1913_v57 = vadd.f32 %v1859_v53, %v1817_v63  ;;  %v2304_v45 = vld [vmem:[#allocation2 + $0x90] sm:$0xff]  ;;  %v2305_v63 = vld [vmem:[#allocation2 + $0x98] sm:$0xff] }
 0x39a   :  { %v1914_v60 = vadd.f32 %v1859_v53, %v1818_v50  ;;  %v1915_v16 = vadd.f32 %v1859_v53, %v1819_v12  ;;  %v1916_v38 = vadd.f32 %v1859_v53, %v1820_v32  ;;  %v4274_v62 = vmul.f32 %v2301_v33, %v1738_v17  ;;  %v1920_v53 = vld [vmem:[%s4498_s2 + $0x18] sm:$0xff]  ;;  %v2306_v50 = vld [vmem:[#allocation2 + $0x150] sm:$0xff]  ;;  %v1922_v32 = vld [vmem:[%s4498_s2 + $0x28] sm:$0xff] }
 0x39b   :  { %v2022_v46 = vadd.f32 %v1966_v43, %v1910_v34  ;;  %v2023_v42 = vadd.f32 %v1967_v26, %v1911_v0  ;;  %v2024_v14 = vadd.f32 %v1968_v11, %v1912_v49  ;;  %v2025_v37 = vadd.f32 %v1969_v7, %v1913_v57  ;;  %v1918_v11 = vld [vmem:[%s4498_s2 + $0x8] sm:$0xff]  ;;  %v1919_v7 = vld [vmem:[%s4498_s2 + $0x10] sm:$0xff] }
 0x39c   :  { %v2026_v10 = vadd.f32 %v1970_v30, %v1914_v60  ;;  %v2027_v15 = vadd.f32 %v1971_v23, %v1915_v16  ;;  %v2028_v48 = vadd.f32 %v1972_v59, %v1916_v38  ;;  %v4224_v55 = vpop.permute.xlu1 %1757  ;;  %v4272_v43 = vmul.f32 %v2300_v27, %v1738_v17 }
 0x39d   :  { %2078 = vst [vmem:[%s4499_s5 + $0x188] sm:$0xff] %v2022_v46  ;;  %2079 = vst [vmem:[%s4499_s5 + $0x190] sm:$0xff] %v2023_v42  ;;  %v4276_v25 = vmul.f32 %v2302_v8, %v1738_v17  ;;  %v4278_v39 = vmul.f32 %v2303_v56, %v1738_v17  ;;  %v4283_v18 = vmul.f32 %v2304_v45, %v1738_v17  ;;  %v1931_v56 = vld [vmem:[%s4498_s2 + $0x70] sm:$0xff] }
 0x39e   :  { %2080 = vst [vmem:[%s4499_s5 + $0x198] sm:$0xff] %v2024_v14  ;;  %2081 = vst [vmem:[%s4499_s5 + $0x1a0] sm:$0xff] %v2025_v37  ;;  %v4285_v20 = vmul.f32 %v2305_v63, %v1738_v17  ;;  %v4288_v26 = vmul.f32 %v1738_v17, %v3947_v9  ;;  %v4300_v12 = vmul.f32 %v2306_v50, %v4224_v55  ;;  %v1921_v9 = vld [vmem:[%s4498_s2 + $0x20] sm:$0xff]  ;;  %v1923_v17 = vld [vmem:[%s4498_s2 + $0x30] sm:$0xff] }
 0x39f   :  { %2082 = vst [vmem:[%s4499_s5 + $0x1a8] sm:$0xff] %v2026_v10  ;;  %2083 = vst [vmem:[%s4499_s5 + $0x1b0] sm:$0xff] %v2027_v15  ;;  %v4316_v60 = vmul.f32 %v2307_v13, %v4224_v55  ;;  %v1948_v37 = vld [vmem:[%s4498_s2 + $0xf8] sm:$0xff]  ;;  %v1949_v15 = vld [vmem:[%s4498_s2 + $0x100] sm:$0xff] }
 0x3a0   :  { %2084 = vst.msk [vmem:[%s4499_s5 + $0x1b8] sm:$0xff] %vm1274_vm0, %v2028_v48  ;;  %v1824_v21 = vpop.permute.xlu1 %1823  ;;  %v1950_v48 = vld [vmem:[%s4498_s2 + $0x108] sm:$0xff]  ;;  %v1936_v50 = vld [vmem:[%s4498_s2 + $0x98] sm:$0xff]  ;;  %v1959_v13 = vld [vmem:[%s4498_s2 + $0x150] sm:$0xff] }
 0x3a1   :  { %v1861_v30 = vadd.f32 %v1824_v21, %v4188_v58  ;;  %v1862_v23 = vadd.f32 %v1824_v21, %v4191_v47  ;;  %v1863_v59 = vadd.f32 %v1824_v21, %v4194_v31  ;;  %v1864_v34 = vadd.f32 %v1824_v21, %v4200_v5  ;;  %v1945_v58 = vld [vmem:[%s4498_s2 + $0xe0] sm:$0xff]  ;;  %v1946_v5 = vld [vmem:[%s4498_s2 + $0xe8] sm:$0xff] }
 0x3a2   :  { %v1865_v0 = vadd.f32 %v1824_v21, %v1769_v3  ;;  %v1866_v49 = vadd.f32 %v1824_v21, %v1770_v6  ;;  %v1867_v57 = vadd.f32 %v1824_v21, %v1771_v28  ;;  %v1947_v3 = vld [vmem:[%s4498_s2 + $0xf0] sm:$0xff]  ;;  %v2308_v6 = vld [vmem:[#allocation2 + $0x160] sm:$0xff] }
 0x3a3   :  { %v1973_v16 = vadd.f32 %v1917_v1, %v1861_v30  ;;  %v1974_v38 = vadd.f32 %v1918_v11, %v1862_v23  ;;  %v1975_v46 = vadd.f32 %v1919_v7, %v1863_v59  ;;  %v1976_v42 = vadd.f32 %v1920_v53, %v1864_v34  ;;  %v1951_v28 = vld [vmem:[%s4498_s2 + $0x110] sm:$0xff] }
 0x3a4   :  { %v1977_v47 = vadd.f32 %v1921_v9, %v1865_v0  ;;  %v1978_v14 = vadd.f32 %v1922_v32, %v1866_v49  ;;  %v1979_v31 = vadd.f32 %v1923_v17, %v1867_v57  ;;  %v1844_v41 = vpop.permute.xlu1 %1843  ;;  %v4331_v10 = vmul.f32 %v2308_v6, %v4224_v55  ;;  %v2310_v7 = vld [vmem:[#allocation2 + $0x170] sm:$0xff]  ;;  %v1937_v9 = vld [vmem:[%s4498_s2 + $0xa0] sm:$0xff] }
 0x3a5   :  { %2029 = vst [vmem:[%s4499_s5] sm:$0xff] %v1973_v16  ;;  %2030 = vst [vmem:[%s4499_s5 + $0x8] sm:$0xff] %v1974_v38  ;;  %v1889_v52 = vadd.f32 %v1844_v41, %v4229_v24  ;;  %v1890_v54 = vadd.f32 %v1844_v41, %v4232_v2  ;;  %v1891_v22 = vadd.f32 %v1844_v41, %v4235_v40  ;;  %v1935_v21 = vld [vmem:[%s4498_s2 + $0x90] sm:$0xff] }
 0x3a6   :  { %2031 = vst [vmem:[%s4499_s5 + $0x10] sm:$0xff] %v1975_v46  ;;  %2032 = vst [vmem:[%s4499_s5 + $0x18] sm:$0xff] %v1976_v42  ;;  %v1892_v35 = vadd.f32 %v1844_v41, %v4250_v44  ;;  %v1893_v24 = vadd.f32 %v1844_v41, %v4253_v29  ;;  %v1894_v2 = vadd.f32 %v1844_v41, %v4256_v4  ;;  %v2309_v44 = vld [vmem:[#allocation2 + $0x168] sm:$0xff]  ;;  %v1932_v29 = vld [vmem:[%s4498_s2 + $0x78] sm:$0xff] }
 0x3a7   :  { %2033 = vst [vmem:[%s4499_s5 + $0x20] sm:$0xff] %v1977_v47  ;;  %2034 = vst [vmem:[%s4499_s5 + $0x28] sm:$0xff] %v1978_v14  ;;  %v1895_v40 = vadd.f32 %v1844_v41, %v4260_v61  ;;  %v1810_v36 = vmul.f32 %v2309_v44, %v4224_v55  ;;  %v2001_v19 = vadd.f32 %v1945_v58, %v1889_v52  ;;  %v1933_v4 = vld [vmem:[%s4498_s2 + $0x80] sm:$0xff]  ;;  %v1934_v61 = vld [vmem:[%s4498_s2 + $0x88] sm:$0xff] }
 0x3a8   :  { %2035 = vst.msk [vmem:[%s4499_s5 + $0x30] sm:$0xff] %vm1274_vm0, %v1979_v31  ;;  %v2002_v27 = vadd.f32 %v1946_v5, %v1890_v54  ;;  %v2003_v33 = vadd.f32 %v1947_v3, %v1891_v22  ;;  %v2004_v8 = vadd.f32 %v1948_v37, %v1892_v35  ;;  %v2005_v1 = vadd.f32 %v1949_v15, %v1893_v24  ;;  %v1834_v11 = vpop.permute.xlu1 %1833  ;;  %v1962_v42 = vld [vmem:[%s4498_s2 + $0x168] sm:$0xff]  ;;  %v1965_v47 = vld [vmem:[%s4498_s2 + $0x180] sm:$0xff] }
 0x3a9   :  { %v2006_v45 = vadd.f32 %v1950_v48, %v1894_v2  ;;  %v2007_v63 = vadd.f32 %v1951_v28, %v1895_v40  ;;  %v1811_v53 = vmul.f32 %v2310_v7, %v4224_v55  ;;  %2057 = vst [vmem:[%s4499_s5 + $0xe0] sm:$0xff] %v2001_v19  ;;  %v1875_v32 = vadd.f32 %v1834_v11, %v4272_v43 }
 0x3aa   :  { %2058 = vst [vmem:[%s4499_s5 + $0xe8] sm:$0xff] %v2002_v27  ;;  %2059 = vst [vmem:[%s4499_s5 + $0xf0] sm:$0xff] %v2003_v33  ;;  %v1876_v17 = vadd.f32 %v1834_v11, %v4274_v62  ;;  %v1877_v30 = vadd.f32 %v1834_v11, %v4276_v25  ;;  %v1878_v23 = vadd.f32 %v1834_v11, %v4278_v39  ;;  %v2311_v39 = vld [vmem:[#allocation2 + $0x178] sm:$0xff] }
 0x3ab   :  { %2060 = vst [vmem:[%s4499_s5 + $0xf8] sm:$0xff] %v2004_v8  ;;  %2061 = vst [vmem:[%s4499_s5 + $0x100] sm:$0xff] %v2005_v1  ;;  %v1879_v43 = vadd.f32 %v1834_v11, %v4283_v18  ;;  %v1880_v62 = vadd.f32 %v1834_v11, %v4285_v20  ;;  %v1881_v25 = vadd.f32 %v1834_v11, %v4288_v26  ;;  %v1960_v20 = vld [vmem:[%s4498_s2 + $0x158] sm:$0xff]  ;;  %v1961_v26 = vld [vmem:[%s4498_s2 + $0x160] sm:$0xff] }
 0x3ac   :  { %2062 = vst [vmem:[%s4499_s5 + $0x108] sm:$0xff] %v2006_v45  ;;  %2063 = vst.msk [vmem:[%s4499_s5 + $0x110] sm:$0xff] %vm1274_vm0, %v2007_v63  ;;  %v1812_v59 = vmul.f32 %v2311_v39, %v4224_v55  ;;  %v1987_v34 = vadd.f32 %v1931_v56, %v1875_v32  ;;  %v1988_v0 = vadd.f32 %v1932_v29, %v1876_v17  ;;  %v1854_v58 = vpop.permute.xlu1 %1853 }
 0x3ad   :  { %v1989_v49 = vadd.f32 %v1933_v4, %v1877_v30  ;;  %v1990_v57 = vadd.f32 %v1934_v61, %v1878_v23  ;;  %v1991_v16 = vadd.f32 %v1935_v21, %v1879_v43  ;;  %v1992_v38 = vadd.f32 %v1936_v50, %v1880_v62 }
 0x3ae   :  { %v1993_v46 = vadd.f32 %v1937_v9, %v1881_v25  ;;  %v1813_v18 = vmul.f32 %v4224_v55, %v3981_v51  ;;  %2043 = vst [vmem:[%s4499_s5 + $0x70] sm:$0xff] %v1987_v34  ;;  %2044 = vst [vmem:[%s4499_s5 + $0x78] sm:$0xff] %v1988_v0  ;;  %v1963_v51 = vld [vmem:[%s4498_s2 + $0x170] sm:$0xff]  ;;  %v1964_v55 = vld [vmem:[%s4498_s2 + $0x178] sm:$0xff]  ;;  %v1903_v14 = vadd.f32 %v1854_v58, %v4300_v12 }
 0x3af   :  { %2045 = vst [vmem:[%s4499_s5 + $0x80] sm:$0xff] %v1989_v49  ;;  %2046 = vst [vmem:[%s4499_s5 + $0x88] sm:$0xff] %v1990_v57  ;;  %v1904_v31 = vadd.f32 %v1854_v58, %v4316_v60  ;;  %v1905_v5 = vadd.f32 %v1854_v58, %v4331_v10  ;;  %v1906_v3 = vadd.f32 %v1854_v58, %v1810_v36 }
 0x3b0   :  { %2047 = vst [vmem:[%s4499_s5 + $0x90] sm:$0xff] %v1991_v16  ;;  %2048 = vst [vmem:[%s4499_s5 + $0x98] sm:$0xff] %v1992_v38  ;;  %v1907_v37 = vadd.f32 %v1854_v58, %v1811_v53  ;;  %v1908_v12 = vadd.f32 %v1854_v58, %v1812_v59  ;;  %v1909_v41 = vadd.f32 %v1854_v58, %v1813_v18 }
 0x3b1   :  { %2049 = vst.msk [vmem:[%s4499_s5 + $0xa0] sm:$0xff] %vm1274_vm0, %v1993_v46  ;;  %v2015_v60 = vadd.f32 %v1959_v13, %v1903_v14  ;;  %v2016_v6 = vadd.f32 %v1960_v20, %v1904_v31  ;;  %v2017_v10 = vadd.f32 %v1961_v26, %v1905_v5  ;;  %v2018_v15 = vadd.f32 %v1962_v42, %v1906_v3 }
 0x3b2   :  { %v2019_v48 = vadd.f32 %v1963_v51, %v1907_v37  ;;  %v2020_v28 = vadd.f32 %v1964_v55, %v1908_v12  ;;  %v2021_v52 = vadd.f32 %v1965_v47, %v1909_v41 }
 0x3b3   :  { %2071 = vst [vmem:[%s4499_s5 + $0x150] sm:$0xff] %v2015_v60  ;;  %2072 = vst [vmem:[%s4499_s5 + $0x158] sm:$0xff] %v2016_v6 }
 0x3b4   :  { %2073 = vst [vmem:[%s4499_s5 + $0x160] sm:$0xff] %v2017_v10  ;;  %2074 = vst [vmem:[%s4499_s5 + $0x168] sm:$0xff] %v2018_v15 }
 0x3b5   :  { %2075 = vst [vmem:[%s4499_s5 + $0x170] sm:$0xff] %v2019_v48  ;;  %2076 = vst [vmem:[%s4499_s5 + $0x178] sm:$0xff] %v2020_v28 }
 0x3b6   :  { %2077 = vst.msk [vmem:[%s4499_s5 + $0x180] sm:$0xff] %vm1274_vm0, %v2021_v52 }

</bundles_post_ra>
